<compile_context>
chip_gen: v7x
topology: tpu7x:2x2x1
jax: 0.10.0
libtpu: 0.0.40
codegen_flags: <defaults>
</compile_context>

<pallas_src>
import functools

import jax
import jax.numpy as jnp
from jax.experimental import pallas as pl
from jax.experimental.pallas import tpu as pltpu


def _round_up(x: int, m: int) -> int:
    return (x + m - 1) // m * m


# Double-buffered pipeline footprint budget.  v7x has only 64 MiB of VMEM per
# TensorCore (v5e/v6e: 128 MiB), so staying under ~36 MiB is safe on every
# generation and leaves headroom for Mosaic's internal scratch.
_VMEM_BUDGET = 36 * 1024 * 1024
_VMEM_LIMIT_CAP = 40 * 1024 * 1024


def _make_mm_kernel(k_total: int, tk: int, out_is_f32: bool):
    """Builds the per-tile matmul body.

    The K remainder (k_total % tk != 0) is masked *in-kernel*, so the wrapper
    never pads the operands (no extra HBM read+write passes).  Out-of-bounds
    data in the M/N tails only feeds output rows/cols whose HBM writes Pallas
    discards, so only the K tail needs masking for correctness.
    """
    rem = k_total % tk

    def _operands(x1_ref, x2_ref):
        a = x1_ref[...]
        b = x2_ref[...]
        if rem != 0:  # static: only emitted when K is not tile-aligned
            kbase = pl.program_id(2) * tk
            ak = jax.lax.broadcasted_iota(jnp.int32, a.shape, 1) + kbase
            a = jnp.where(ak < k_total, a, jnp.zeros_like(a))
            bk = jax.lax.broadcasted_iota(jnp.int32, b.shape, 0) + kbase
            b = jnp.where(bk < k_total, b, jnp.zeros_like(b))
        return a, b

    if out_is_f32:
        # f32 output: accumulate directly into the resident output block (same
        # (i, j) block index across the whole K axis) -> no scratch accumulator
        # and no copy/cast pass on the last K step.
        def kernel(x1_ref, x2_ref, o_ref):
            k = pl.program_id(2)
            a, b = _operands(x1_ref, x2_ref)
            p = jnp.dot(a, b, preferred_element_type=jnp.float32)

            @pl.when(k == 0)
            def _():
                o_ref[...] = p  # first K step writes (no zero-fill + add pass)

            @pl.when(k != 0)
            def _():
                o_ref[...] += p

        return kernel

    # Non-f32 output: keep an f32 scratch accumulator, cast on the last step.
    def kernel(x1_ref, x2_ref, o_ref, acc_ref):
        k = pl.program_id(2)
        a, b = _operands(x1_ref, x2_ref)
        p = jnp.dot(a, b, preferred_element_type=jnp.float32)

        @pl.when(k == 0)
        def _():
            acc_ref[...] = p

        @pl.when(k != 0)
        def _():
            acc_ref[...] += p

        @pl.when(k == pl.num_programs(2) - 1)
        def _():
            o_ref[...] = acc_ref[...].astype(o_ref.dtype)

    return kernel


@functools.partial(jax.jit, static_argnames=("tm", "tn", "tk"))
def pallas_mm(x1: jax.Array, x2: jax.Array, *, tm: int = 512, tn: int = 512,
              tk: int = 1024) -> jax.Array:
    """Tiled matmul (M, K) @ (K, N) -> (M, N), auto-pipelined BlockSpecs."""
    M, K = x1.shape
    K2, N = x2.shape
    assert K == K2, f"inner dims must match, got {K} vs {K2}"
    out_dtype = jnp.result_type(x1.dtype, x2.dtype)
    out_is_f32 = jnp.dtype(out_dtype) == jnp.float32

    # --- shape-adaptive tiling (no host-side padding, no output slice) ------
    # A dim smaller than 2x the preferred tile collapses into a single block
    # (128-aligned for M/N; exact full dim for K, which is layout-legal and
    # avoids the in-kernel remainder mask).  Larger dims keep the preferred
    # 128/256-multiple tile with a cdiv grid.
    tm = _round_up(M, 128) if M < 2 * tm else tm
    tn = _round_up(N, 128) if N < 2 * tn else tn
    tk = K if K < 2 * tk else tk

    # --- keep the double-buffered footprint inside the VMEM budget ----------
    in_b = x1.dtype.itemsize
    out_b = jnp.dtype(out_dtype).itemsize

    def _footprint(tm_, tn_, tk_):
        f = 2 * (tm_ * tk_ + tk_ * tn_) * in_b + 2 * tm_ * tn_ * out_b
        if not out_is_f32:
            f += tm_ * tn_ * 4  # f32 scratch accumulator
        return f

    while _footprint(tm, tn, tk) > _VMEM_BUDGET and tk > 512:
        tk = max(512, _round_up(tk // 2, 128))
    while _footprint(tm, tn, tk) > _VMEM_BUDGET and max(tm, tn) > 256:
        if tm >= tn:
            tm = max(256, _round_up(tm // 2, 128))
        else:
            tn = max(256, _round_up(tn // 2, 128))

    grid = (pl.cdiv(M, tm), pl.cdiv(N, tn), pl.cdiv(K, tk))  # K (reduction) last

    kernel = _make_mm_kernel(K, tk, out_is_f32)
    scratch_shapes = [] if out_is_f32 else [pltpu.VMEM((tm, tn), jnp.float32)]

    vmem_limit = min(
        max(32 * 1024 * 1024, _footprint(tm, tn, tk) + 4 * 1024 * 1024),
        _VMEM_LIMIT_CAP,
    )

    flops = 2 * M * N * K
    bytes_accessed = M * K * in_b + K * N * in_b + M * N * out_b

    return pl.pallas_call(
        kernel,
        out_shape=jax.ShapeDtypeStruct((M, N), out_dtype),
        grid_spec=pltpu.PrefetchScalarGridSpec(
            num_scalar_prefetch=0,
            grid=grid,
            in_specs=[
                pl.BlockSpec((tm, tk), lambda i, j, k: (i, k)),
                pl.BlockSpec((tk, tn), lambda i, j, k: (k, j)),
            ],
            out_specs=pl.BlockSpec((tm, tn), lambda i, j, k: (i, j)),
            scratch_shapes=scratch_shapes,
        ),
        compiler_params=pltpu.CompilerParams(
            # M/N parallel (megacore sharding); K is the sequential reduction
            # over the resident output/accumulator block.
            dimension_semantics=("parallel", "parallel", "arbitrary"),
            vmem_limit_bytes=vmem_limit,
        ),
        cost_estimate=pl.CostEstimate(
            flops=flops, bytes_accessed=bytes_accessed, transcendentals=0
        ),
    )(x1, x2)


# Below this, custom-call launch + per-grid-step overhead dominates; XLA's
# fused dot is faster, so skip the Pallas path for tiny shapes (e.g. the
# module's literal (3, x) operands).
_MIN_PALLAS_DIM = 128


def model_forward(x1: jax.Array, x2: jax.Array) -> jax.Array:
    """Mirrors Model.forward: only mm(x1, x2) is returned (cat is dead code)."""
    M, K = x1.shape
    _, N = x2.shape
    if min(M, K, N) < _MIN_PALLAS_DIM:
        return jnp.dot(x1, x2)
    return pallas_mm(x1, x2)


if __name__ == "__main__":
    key = jax.random.PRNGKey(0)
    k1, k2 = jax.random.split(key)

    # 1) Default Pallas path: shape-adaptive tiles collapse this to a single
    #    (384, 320) x (320, 256) block -- no padding, one grid step.
    M, K, N = 384, 320, 256
    x1 = jax.random.normal(k1, (M, K), dtype=jnp.float32)
    x2 = jax.random.normal(k2, (K, N), dtype=jnp.float32)
    out = jax.block_until_ready(model_forward(x1, x2))
    ref = x1 @ x2
    assert out.shape == (M, N)
    assert jnp.allclose(out, ref, atol=1e-3, rtol=1e-4), "mismatch vs reference"

    # 2) Force small tiles to exercise the multi-block grid, the resident-
    #    output K accumulation, and the in-kernel K-remainder masking
    #    (K=320 with tk=128 -> partial last K block).
    out2 = jax.block_until_ready(pallas_mm(x1, x2, tm=128, tn=128, tk=128))
    assert jnp.allclose(out2, ref, atol=1e-3, rtol=1e-4), "tiled-path mismatch"

    # 3) Module-literal-sized tiny operands go through the jnp.dot fallback.
    xs = jax.random.normal(k1, (3, 8), dtype=jnp.float32)
    ys = jax.random.normal(k2, (8, 2), dtype=jnp.float32)
    outs = jax.block_until_ready(model_forward(xs, ys))
    assert outs.shape == (3, 2)
    assert jnp.allclose(outs, xs @ ys, atol=1e-5, rtol=1e-5), "fallback mismatch"

    print("KERNEL_OK")
</pallas_src>

<mosaic_0001>
module attributes {stable_mosaic.version = 11 : i64} {
  func.func @kernel(%arg0: i32, %arg1: i32, %arg2: i32, %arg3: memref<384x320xf32, #tpu.memory_space<vmem>>, %arg4: memref<320x256xf32, #tpu.memory_space<vmem>>, %arg5: memref<384x256xf32, #tpu.memory_space<vmem>>) attributes {dimension_semantics = [#tpu.dimension_semantics<parallel>, #tpu.dimension_semantics<parallel>, #tpu.dimension_semantics<arbitrary>], iteration_bounds = array<i64: 1, 1, 1>, scalar_prefetch = 0 : i64, scratch_operands = 0 : i64, tpu.core_type = #tpu.core_type<tc>, window_params = [{transform_indices = @transform_0, window_bounds = array<i64: 384, 320>}, {transform_indices = @transform_1, window_bounds = array<i64: 320, 256>}, {transform_indices = @transform_2, window_bounds = array<i64: 384, 256>}]} {
    %c0 = arith.constant 0 : index
    %c0_0 = arith.constant 0 : index
    %0 = vector.load %arg3[%c0, %c0_0] : memref<384x320xf32, #tpu.memory_space<vmem>>, vector<384x320xf32>
    %c0_1 = arith.constant 0 : index
    %c0_2 = arith.constant 0 : index
    %1 = vector.load %arg4[%c0_1, %c0_2] : memref<320x256xf32, #tpu.memory_space<vmem>>, vector<320x256xf32>
    %cst = arith.constant dense<0.000000e+00> : vector<384x256xf32>
    %2 = tpu.matmul %0, %1, %cst {dimension_numbers = #tpu.dot_dimension_numbers<[1], [0], [0], [1], [0, 0, 1, 1], [], []>} : vector<384x320xf32>, vector<320x256xf32>, vector<384x256xf32> -> vector<384x256xf32>
    %c0_i32 = arith.constant 0 : i32
    %3 = arith.cmpi eq, %arg2, %c0_i32 : i32
    %4 = arith.extui %3 : i1 to i32
    %c0_i32_3 = arith.constant 0 : i32
    %5 = arith.cmpi ne, %4, %c0_i32_3 : i32
    scf.if %5 {
      %c0_6 = arith.constant 0 : index
      %c0_7 = arith.constant 0 : index
      %9 = vector.load %arg5[%c0_6, %c0_7] : memref<384x256xf32, #tpu.memory_space<vmem>>, vector<384x256xf32>
      tpu.vector_store %arg5[%c0_6, %c0_7], %2 {strides = array<i32>} : memref<384x256xf32, #tpu.memory_space<vmem>>, vector<384x256xf32>,
    } else {
    }
    %c0_i32_4 = arith.constant 0 : i32
    %6 = arith.cmpi ne, %arg2, %c0_i32_4 : i32
    %7 = arith.extui %6 : i1 to i32
    %c0_i32_5 = arith.constant 0 : i32
    %8 = arith.cmpi ne, %7, %c0_i32_5 : i32
    scf.if %8 {
      %c0_6 = arith.constant 0 : index
      %c0_7 = arith.constant 0 : index
      %9 = vector.load %arg5[%c0_6, %c0_7] : memref<384x256xf32, #tpu.memory_space<vmem>>, vector<384x256xf32>
      %10 = arith.addf %9, %2 : vector<384x256xf32>
      %c0_8 = arith.constant 0 : index
      %c0_9 = arith.constant 0 : index
      %11 = vector.load %arg5[%c0_8, %c0_9] : memref<384x256xf32, #tpu.memory_space<vmem>>, vector<384x256xf32>
      tpu.vector_store %arg5[%c0_8, %c0_9], %10 {strides = array<i32>} : memref<384x256xf32, #tpu.memory_space<vmem>>, vector<384x256xf32>,
    } else {
    }
    return
  }
  func.func @transform_0(%arg0: i32, %arg1: i32, %arg2: i32) -> (i32, i32) {
    %c0_i32 = arith.constant 0 : i32
    return %arg0, %arg2 : i32, i32
  }
  func.func @transform_1(%arg0: i32, %arg1: i32, %arg2: i32) -> (i32, i32) {
    %c0_i32 = arith.constant 0 : i32
    return %arg2, %arg1 : i32, i32
  }
  func.func @transform_2(%arg0: i32, %arg1: i32, %arg2: i32) -> (i32, i32) {
    %c0_i32 = arith.constant 0 : i32
    return %arg0, %arg1 : i32, i32
  }
}

</mosaic_0001>

<bundles_post_ra>
// kernel: pallas_mm.1
= control target key start
LH: loop header
LB: loop body
LE: loop exit
PB: predicated region body
PF: predicated region fallthrough
CT: control target
= control target key end

     0   :  { %v1747_v7 = vmov 0.0   ;;  %vm236_vm0 = vcmask 523264   ;;  %s2744_s0 = inlined_call_operand.vmem [shape: f32[384,320], index: 0, kind: input, shape index: {}]   ;;  %s2745_s1 = inlined_call_operand.vmem [shape: f32[320,256], index: 1, kind: input, shape index: {}]   ;;  %s2746_s2 = inlined_call_operand.hbm [shape: f32[384,256], index: 2, kind: output, shape index: {}]  }
   0x1   :  { %v157_v0 = vld [vmem:[%s2745_s1 + $0x8] sm:$0xff]  ;;  %v159_v1 = vld [vmem:[%s2745_s1 + $0x18] sm:$0xff]  ;;  %v156_v2 = vld [vmem:[%s2745_s1] sm:$0xff]  ;;  %798 = vmatprep.mubr.f32.mxu0 %v1747_v7 }
   0x2   :  { %v1543_v3 = vpack.c.bf16 %v159_v1, %v157_v0  ;;  %v158_v4 = vld [vmem:[%s2745_s1 + $0x10] sm:$0xff]  ;;  %v161_v5 = vld [vmem:[%s2745_s1 + $0x28] sm:$0xff]  ;;  %v163_v6 = vld [vmem:[%s2745_s1 + $0x38] sm:$0xff] }
   0x3   :  { %v1545_v8 = vpack.c.bf16 %v158_v4, %v156_v2  ;;  %v1547_v9 = vpack.c.bf16 %v163_v6, %v161_v5  ;;  %v160_v10 = vld [vmem:[%s2745_s1 + $0x20] sm:$0xff]  ;;  %v162_v11 = vld [vmem:[%s2745_s1 + $0x30] sm:$0xff]  ;;  %v165_v12 = vld [vmem:[%s2745_s1 + $0x48] sm:$0xff] }
   0x4   :  { %1544 = vmatprep.subr.bf16.mxu1 %v1543_v3  ;;  %v167_v13 = vld [vmem:[%s2745_s1 + $0x58] sm:$0xff]  ;;  %v1549_v14 = vpack.c.bf16 %v162_v11, %v160_v10  ;;  %v164_v16 = vld [vmem:[%s2745_s1 + $0x40] sm:$0xff]  ;;  %v166_v17 = vld [vmem:[%s2745_s1 + $0x50] sm:$0xff] }
   0x5   :  { %1546 = vmatpush1.bf16.msra.mxu1 %v1545_v8  ;;  %v1551_v15 = vpack.c.bf16 %v167_v13, %v165_v12  ;;  %v169_v18 = vld [vmem:[%s2745_s1 + $0x68] sm:$0xff]  ;;  %v171_v19 = vld [vmem:[%s2745_s1 + $0x78] sm:$0xff]  ;;  %v1553_v20 = vpack.c.bf16 %v166_v17, %v164_v16  ;;  %v168_v22 = vld [vmem:[%s2745_s1 + $0x60] sm:$0xff] }
   0x6   :  { %1548 = vmatprep.subr.bf16.mxu1 %v1547_v9  ;;  %v1555_v21 = vpack.c.bf16 %v171_v19, %v169_v18  ;;  %v170_v23 = vld [vmem:[%s2745_s1 + $0x70] sm:$0xff]  ;;  %v173_v24 = vld [vmem:[%s2745_s1 + $0x88] sm:$0xff]  ;;  %v175_v25 = vld [vmem:[%s2745_s1 + $0x98] sm:$0xff] }
   0x7   :  { %v1557_v26 = vpack.c.bf16 %v170_v23, %v168_v22  ;;  %v1559_v27 = vpack.c.bf16 %v175_v25, %v173_v24  ;;  %v172_v28 = vld [vmem:[%s2745_s1 + $0x80] sm:$0xff]  ;;  %v174_v29 = vld [vmem:[%s2745_s1 + $0x90] sm:$0xff]  ;;  %v177_v30 = vld [vmem:[%s2745_s1 + $0xa8] sm:$0xff] }
   0x8   :  { %v179_v31 = vld [vmem:[%s2745_s1 + $0xb8] sm:$0xff]  ;;  %v1561_v32 = vpack.c.bf16 %v174_v29, %v172_v28  ;;  %v176_v33 = vld [vmem:[%s2745_s1 + $0xa0] sm:$0xff]  ;;  %v221_v34 = vld [vmem:[%s2745_s1 + $0x208] sm:$0xff] }
   0x9   :  { %1550 = vmatpush1.bf16.msra.mxu1 %v1549_v14  ;;  %v223_v35 = vld [vmem:[%s2745_s1 + $0x218] sm:$0xff]  ;;  %v1563_v36 = vpack.c.bf16 %v179_v31, %v177_v30  ;;  %v178_v37 = vld [vmem:[%s2745_s1 + $0xb0] sm:$0xff]  ;;  %v220_v39 = vld [vmem:[%s2745_s1 + $0x200] sm:$0xff] }
   0xa   :  { %1552 = vmatprep.subr.bf16.mxu1 %v1551_v15  ;;  %v1607_v38 = vpack.c.bf16 %v223_v35, %v221_v34  ;;  %v222_v40 = vld [vmem:[%s2745_s1 + $0x210] sm:$0xff]  ;;  %v181_v41 = vld [vmem:[%s2745_s1 + $0xc8] sm:$0xff]  ;;  %v183_v42 = vld [vmem:[%s2745_s1 + $0xd8] sm:$0xff]  ;;  %v1565_v46 = vpack.c.bf16 %v178_v37, %v176_v33 }
   0xb   :  { %v1609_v43 = vpack.c.bf16 %v222_v40, %v220_v39  ;;  %v225_v44 = vld [vmem:[%s2745_s1 + $0x228] sm:$0xff]  ;;  %v227_v45 = vld [vmem:[%s2745_s1 + $0x238] sm:$0xff]  ;;  %v180_v47 = vld [vmem:[%s2745_s1 + $0xc0] sm:$0xff]  ;;  %v1567_v51 = vpack.c.bf16 %v183_v42, %v181_v41 }
   0xc   :  { %1608 = vmatprep.subr.bf16.mxu0 %v1607_v38  ;;  %v1611_v48 = vpack.c.bf16 %v227_v45, %v225_v44  ;;  %v224_v49 = vld [vmem:[%s2745_s1 + $0x220] sm:$0xff]  ;;  %v226_v50 = vld [vmem:[%s2745_s1 + $0x230] sm:$0xff]  ;;  %v229_v54 = vld [vmem:[%s2745_s1 + $0x248] sm:$0xff] }
   0xd   :  { %1554 = vmatpush1.bf16.msra.mxu1 %v1553_v20  ;;  %1610 = vmatpush1.bf16.msra.mxu0 %v1609_v43  ;;  %v182_v52 = vld [vmem:[%s2745_s1 + $0xd0] sm:$0xff]  ;;  %v1613_v53 = vpack.c.bf16 %v226_v50, %v224_v49  ;;  %v231_v55 = vld [vmem:[%s2745_s1 + $0x258] sm:$0xff]  ;;  %v185_v56 = vld [vmem:[%s2745_s1 + $0xe8] sm:$0xff] }
   0xe   :  { %1556 = vmatprep.subr.bf16.mxu1 %v1555_v21  ;;  %v187_v57 = vld [vmem:[%s2745_s1 + $0xf8] sm:$0xff]  ;;  %1612 = vmatprep.subr.bf16.mxu0 %v1611_v48  ;;  %v1615_v58 = vpack.c.bf16 %v231_v55, %v229_v54  ;;  %v228_v59 = vld [vmem:[%s2745_s1 + $0x240] sm:$0xff]  ;;  %v230_v60 = vld [vmem:[%s2745_s1 + $0x250] sm:$0xff]  ;;  %v1569_v61 = vpack.c.bf16 %v182_v52, %v180_v47 }
   0xf   :  { %v184_v62 = vld [vmem:[%s2745_s1 + $0xe0] sm:$0xff]  ;;  %v1617_v63 = vpack.c.bf16 %v230_v60, %v228_v59  ;;  %v233_v0 = vld [vmem:[%s2745_s1 + $0x268] sm:$0xff]  ;;  %v235_v1 = vld [vmem:[%s2745_s1 + $0x278] sm:$0xff]  ;;  %v1571_v2 = vpack.c.bf16 %v187_v57, %v185_v56 }
  0x10   :  { %v186_v3 = vld [vmem:[%s2745_s1 + $0xf0] sm:$0xff]  ;;  %v1619_v4 = vpack.c.bf16 %v235_v1, %v233_v0  ;;  %v232_v5 = vld [vmem:[%s2745_s1 + $0x260] sm:$0xff]  ;;  %v189_v8 = vld [vmem:[%s2745_s1 + $0x108] sm:$0xff] }
  0x11   :  { %1558 = vmatpush1.bf16.msra.mxu1 %v1557_v26  ;;  %1614 = vmatpush1.bf16.msra.mxu0 %v1613_v53  ;;  %v234_v6 = vld [vmem:[%s2745_s1 + $0x270] sm:$0xff]  ;;  %v191_v9 = vld [vmem:[%s2745_s1 + $0x118] sm:$0xff]  ;;  %v13_v10 = vld [vmem:[%s2744_s0 + $0x8] sm:$0xff]  ;;  %v1573_v11 = vpack.c.bf16 %v186_v3, %v184_v62 }
  0x12   :  { %1560 = vmatprep.subr.bf16.mxu1 %v1559_v27  ;;  %1616 = vmatprep.subr.bf16.mxu0 %v1615_v58  ;;  %v1621_v12 = vpack.c.bf16 %v234_v6, %v232_v5  ;;  %v1575_v13 = vpack.c.bf16 %v191_v9, %v189_v8  ;;  %v188_v14 = vld [vmem:[%s2745_s1 + $0x100] sm:$0xff]  ;;  %v190_v15 = vld [vmem:[%s2745_s1 + $0x110] sm:$0xff]  ;;  %v193_v16 = vld [vmem:[%s2745_s1 + $0x128] sm:$0xff] }
  0x13   :  { %445 = vmatprep.mubr.f32.mxu1 %v13_v10  ;;  %v195_v17 = vld [vmem:[%s2745_s1 + $0x138] sm:$0xff]  ;;  %v1577_v18 = vpack.c.bf16 %v190_v15, %v188_v14  ;;  %v14_v19 = vld [vmem:[%s2744_s0 + $0x10] sm:$0xff]  ;;  %v192_v21 = vld [vmem:[%s2745_s1 + $0x120] sm:$0xff] }
  0x14   :  { %v1579_v20 = vpack.c.bf16 %v195_v17, %v193_v16  ;;  %v194_v22 = vld [vmem:[%s2745_s1 + $0x130] sm:$0xff]  ;;  %v197_v23 = vld [vmem:[%s2745_s1 + $0x148] sm:$0xff]  ;;  %v199_v24 = vld [vmem:[%s2745_s1 + $0x158] sm:$0xff] }
  0x15   :  { %1562 = vmatpush1.bf16.msra.mxu1 %v1561_v32  ;;  %1618 = vmatpush1.bf16.msra.mxu0 %v1617_v63  ;;  %v1581_v25 = vpack.c.bf16 %v194_v22, %v192_v21  ;;  %v17_v26 = vld [vmem:[%s2744_s0 + $0x28] sm:$0xff]  ;;  %v1583_v27 = vpack.c.bf16 %v199_v24, %v197_v23  ;;  %v196_v28 = vld [vmem:[%s2745_s1 + $0x140] sm:$0xff]  ;;  %v198_v29 = vld [vmem:[%s2745_s1 + $0x150] sm:$0xff] }
  0x16   :  { %1564 = vmatprep.subr.bf16.mxu1 %v1563_v36  ;;  %1620 = vmatprep.subr.bf16.mxu0 %v1619_v4  ;;  %v201_v30 = vld [vmem:[%s2745_s1 + $0x168] sm:$0xff]  ;;  %v203_v31 = vld [vmem:[%s2745_s1 + $0x178] sm:$0xff]  ;;  %v1585_v32 = vpack.c.bf16 %v198_v29, %v196_v28  ;;  %v20_v33 = vld [vmem:[%s2744_s0 + $0x40] sm:$0xff] }
  0x17   :  { %v1587_v34 = vpack.c.bf16 %v203_v31, %v201_v30  ;;  %v200_v35 = vld [vmem:[%s2745_s1 + $0x160] sm:$0xff]  ;;  %v202_v36 = vld [vmem:[%s2745_s1 + $0x170] sm:$0xff]  ;;  %v205_v37 = vld [vmem:[%s2745_s1 + $0x188] sm:$0xff] }
  0x18   :  { %v207_v38 = vld [vmem:[%s2745_s1 + $0x198] sm:$0xff]  ;;  %v1589_v39 = vpack.c.bf16 %v202_v36, %v200_v35  ;;  %v204_v42 = vld [vmem:[%s2745_s1 + $0x180] sm:$0xff]  ;;  %v206_v43 = vld [vmem:[%s2745_s1 + $0x190] sm:$0xff] }
  0x19   :  { %1566 = vmatpush1.bf16.msra.mxu1 %v1565_v46  ;;  %1622 = vmatpush1.bf16.msra.mxu0 %v1621_v12  ;;  %v23_v40 = vld [vmem:[%s2744_s0 + $0x58] sm:$0xff]  ;;  %v1591_v41 = vpack.c.bf16 %v207_v38, %v205_v37  ;;  %v209_v44 = vld [vmem:[%s2745_s1 + $0x1a8] sm:$0xff]  ;;  %v1593_v46 = vpack.c.bf16 %v206_v43, %v204_v42  ;;  %v26_v47 = vld [vmem:[%s2744_s0 + $0x70] sm:$0xff] }
  0x1a   :  { %1568 = vmatprep.subr.bf16.mxu1 %v1567_v51  ;;  %v211_v45 = vld [vmem:[%s2745_s1 + $0x1b8] sm:$0xff]  ;;  %v208_v49 = vld [vmem:[%s2745_s1 + $0x1a0] sm:$0xff]  ;;  %v210_v50 = vld [vmem:[%s2745_s1 + $0x1b0] sm:$0xff] }
  0x1b   :  { %v1595_v48 = vpack.c.bf16 %v211_v45, %v209_v44  ;;  %v213_v51 = vld [vmem:[%s2745_s1 + $0x1c8] sm:$0xff]  ;;  %v215_v52 = vld [vmem:[%s2745_s1 + $0x1d8] sm:$0xff]  ;;  %v1597_v53 = vpack.c.bf16 %v210_v50, %v208_v49  ;;  %v212_v56 = vld [vmem:[%s2745_s1 + $0x1c0] sm:$0xff] }
  0x1c   :  { %1495 = vmatmul.mubr.msk.f32.vlgmr.msra.gmra.mrb[0].mxu0 %vm236_vm0, %v14_v19  ;;  %v29_v54 = vld [vmem:[%s2744_s0 + $0x88] sm:$0xff]  ;;  %v1599_v55 = vpack.c.bf16 %v215_v52, %v213_v51  ;;  %v214_v57 = vld [vmem:[%s2745_s1 + $0x1d0] sm:$0xff]  ;;  %v219_v59 = vld [vmem:[%s2745_s1 + $0x1f8] sm:$0xff] }
  0x1d   :  { %1570 = vmatpush1.bf16.msra.mxu1 %v1569_v61  ;;  %804 = vmatprep.mubr.f32.mxu0 %v1747_v7  ;;  %v217_v58 = vld [vmem:[%s2745_s1 + $0x1e8] sm:$0xff]  ;;  %v1601_v60 = vpack.c.bf16 %v214_v57, %v212_v56  ;;  %v32_v61 = vld [vmem:[%s2744_s0 + $0xa0] sm:$0xff]  ;;  %v218_v0 = vld [vmem:[%s2745_s1 + $0x1f0] sm:$0xff] }
  0x1e   :  { %1572 = vmatprep.subr.bf16.mxu1 %v1571_v2  ;;  %v1603_v62 = vpack.c.bf16 %v219_v59, %v217_v58  ;;  %v216_v63 = vld [vmem:[%s2745_s1 + $0x1e0] sm:$0xff] }
  0x20   :  { %1496 = vmatmul.mubr.msk.f32.gmra.mrb[2].mxu0 %vm236_vm0, %v17_v26 }
  0x21   :  { %1574 = vmatpush1.bf16.msra.mxu1 %v1573_v11  ;;  %810 = vmatprep.mubr.f32.mxu0 %v1747_v7 }
  0x22   :  { %1576 = vmatprep.subr.bf16.mxu1 %v1575_v13 }
  0x24   :  { %1497 = vmatmul.mubr.msk.f32.gmra.mrb[4].mxu0 %vm236_vm0, %v20_v33 }
  0x25   :  { %1578 = vmatpush1.bf16.msra.mxu1 %v1577_v18  ;;  %816 = vmatprep.mubr.f32.mxu0 %v1747_v7 }
  0x26   :  { %1580 = vmatprep.subr.bf16.mxu1 %v1579_v20 }
  0x28   :  { %1498 = vmatmul.mubr.msk.f32.gmra.mrb[6].mxu0 %vm236_vm0, %v23_v40 }
  0x29   :  { %1582 = vmatpush1.bf16.msra.mxu1 %v1581_v25  ;;  %822 = vmatprep.mubr.f32.mxu0 %v1747_v7 }
  0x2a   :  { %1584 = vmatprep.subr.bf16.mxu1 %v1583_v27 }
  0x2c   :  { %1499 = vmatmul.mubr.msk.f32.gmra.mrb[8].mxu0 %vm236_vm0, %v26_v47 }
  0x2d   :  { %1586 = vmatpush1.bf16.msra.mxu1 %v1585_v32  ;;  %828 = vmatprep.mubr.f32.mxu0 %v1747_v7 }
  0x2e   :  { %1588 = vmatprep.subr.bf16.mxu1 %v1587_v34 }
  0x30   :  { %1500 = vmatmul.mubr.msk.f32.gmra.mrb[10].mxu0 %vm236_vm0, %v29_v54 }
  0x31   :  { %1590 = vmatpush1.bf16.msra.mxu1 %v1589_v39  ;;  %834 = vmatprep.mubr.f32.mxu0 %v1747_v7 }
  0x32   :  { %1592 = vmatprep.subr.bf16.mxu1 %v1591_v41 }
  0x35   :  { %1594 = vmatpush1.bf16.msra.mxu1 %v1593_v46 }
  0x36   :  { %1596 = vmatprep.subr.bf16.mxu1 %v1595_v48 }
  0x39   :  { %1598 = vmatpush1.bf16.msra.mxu1 %v1597_v53 }
  0x3a   :  { %1600 = vmatprep.subr.bf16.mxu1 %v1599_v55 }
  0x3b   :  { %7 = vsyncpa [#allocation3], 0  ;;  %1501 = vmatmul.mubr.msk.f32.gmra.mrb[12].mxu0 %vm236_vm0, %v32_v61  ;;  %v1605_v1 = vpack.c.bf16 %v218_v0, %v216_v63  ;;  %v35_v2 = vld [vmem:[%s2744_s0 + $0xb8] sm:$0xff]  ;;  %v12_v3 = vld [vmem:[%s2744_s0] sm:$0xff] }
  0x3c   :  { %840 = vmatprep.mubr.f32.mxu0 %v1747_v7  ;;  %v38_v4 = vld [vmem:[%s2744_s0 + $0xd0] sm:$0xff]  ;;  %v16_v5 = vld [vmem:[%s2744_s0 + $0x20] sm:$0xff]  ;;  %v15_v6 = vld [vmem:[%s2744_s0 + $0x18] sm:$0xff] }
  0x3d   :  { %1602 = vmatpush1.bf16.msra.mxu1 %v1601_v60  ;;  %v41_v8 = vld [vmem:[%s2744_s0 + $0xe8] sm:$0xff]  ;;  %v19_v9 = vld [vmem:[%s2744_s0 + $0x38] sm:$0xff]  ;;  %v18_v10 = vld [vmem:[%s2744_s0 + $0x30] sm:$0xff] }
  0x3e   :  { %1604 = vmatprep.subr.bf16.mxu1 %v1603_v62  ;;  %v44_v11 = vld [vmem:[%s2744_s0 + $0x100] sm:$0xff]  ;;  %v22_v12 = vld [vmem:[%s2744_s0 + $0x50] sm:$0xff]  ;;  %v21_v13 = vld [vmem:[%s2744_s0 + $0x48] sm:$0xff] }
  0x3f   :  { %1502 = vmatmul.mubr.msk.f32.gmra.mrb[14].mxu0 %vm236_vm0, %v35_v2  ;;  %v47_v14 = vld [vmem:[%s2744_s0 + $0x118] sm:$0xff]  ;;  %v25_v15 = vld [vmem:[%s2744_s0 + $0x68] sm:$0xff]  ;;  %v24_v16 = vld [vmem:[%s2744_s0 + $0x60] sm:$0xff] }
  0x40   :  { %846 = vmatprep.mubr.f32.mxu0 %v1747_v7  ;;  %v50_v17 = vld [vmem:[%s2744_s0 + $0x130] sm:$0xff]  ;;  %v28_v18 = vld [vmem:[%s2744_s0 + $0x80] sm:$0xff]  ;;  %v27_v19 = vld [vmem:[%s2744_s0 + $0x78] sm:$0xff] }
  0x41   :  { %1606 = vmatpush1.bf16.msra.mxu1 %v1605_v1  ;;  %v53_v20 = vld [vmem:[%s2744_s0 + $0x148] sm:$0xff]  ;;  %v31_v21 = vld [vmem:[%s2744_s0 + $0x98] sm:$0xff]  ;;  %v30_v22 = vld [vmem:[%s2744_s0 + $0x90] sm:$0xff] }
  0x42   :  { %v56_v23 = vld [vmem:[%s2744_s0 + $0x160] sm:$0xff]  ;;  %v34_v24 = vld [vmem:[%s2744_s0 + $0xb0] sm:$0xff]  ;;  %v33_v25 = vld [vmem:[%s2744_s0 + $0xa8] sm:$0xff] }
  0x43   :  { %1503 = vmatmul.mubr.msk.f32.gmra.mrb[16].mxu0 %vm236_vm0, %v38_v4  ;;  %v59_v26 = vld [vmem:[%s2744_s0 + $0x178] sm:$0xff]  ;;  %v37_v27 = vld [vmem:[%s2744_s0 + $0xc8] sm:$0xff]  ;;  %v36_v28 = vld [vmem:[%s2744_s0 + $0xc0] sm:$0xff] }
  0x44   :  { %446 = vmatmul.mubr.f32.vlgmr.msra.gmra.mrb[0].mxu1 %v12_v3  ;;  %852 = vmatprep.mubr.f32.mxu0 %v1747_v7  ;;  %v62_v29 = vld [vmem:[%s2744_s0 + $0x190] sm:$0xff]  ;;  %v40_v30 = vld [vmem:[%s2744_s0 + $0xe0] sm:$0xff]  ;;  %v39_v31 = vld [vmem:[%s2744_s0 + $0xd8] sm:$0xff] }
  0x45   :  { %451 = vmatprep.mubr.f32.mxu1 %v16_v5  ;;  %v65_v32 = vld [vmem:[%s2744_s0 + $0x1a8] sm:$0xff]  ;;  %v43_v33 = vld [vmem:[%s2744_s0 + $0xf8] sm:$0xff]  ;;  %v42_v34 = vld [vmem:[%s2744_s0 + $0xf0] sm:$0xff] }
  0x46   :  { %v68_v35 = vld [vmem:[%s2744_s0 + $0x1c0] sm:$0xff]  ;;  %v46_v36 = vld [vmem:[%s2744_s0 + $0x110] sm:$0xff]  ;;  %v45_v37 = vld [vmem:[%s2744_s0 + $0x108] sm:$0xff] }
  0x47   :  { %1504 = vmatmul.mubr.msk.f32.gmra.mrb[18].mxu0 %vm236_vm0, %v41_v8  ;;  %v71_v38 = vld [vmem:[%s2744_s0 + $0x1d8] sm:$0xff]  ;;  %v49_v39 = vld [vmem:[%s2744_s0 + $0x128] sm:$0xff]  ;;  %v48_v40 = vld [vmem:[%s2744_s0 + $0x120] sm:$0xff] }
  0x48   :  { %452 = vmatmul.mubr.f32.gmra.mrb[2].mxu1 %v15_v6  ;;  %858 = vmatprep.mubr.f32.mxu0 %v1747_v7  ;;  %v74_v41 = vld [vmem:[%s2744_s0 + $0x1f0] sm:$0xff]  ;;  %v52_v42 = vld [vmem:[%s2744_s0 + $0x140] sm:$0xff]  ;;  %v51_v43 = vld [vmem:[%s2744_s0 + $0x138] sm:$0xff] }
  0x49   :  { %457 = vmatprep.mubr.f32.mxu1 %v19_v9  ;;  %v77_v44 = vld [vmem:[%s2744_s0 + $0x208] sm:$0xff]  ;;  %v55_v45 = vld [vmem:[%s2744_s0 + $0x158] sm:$0xff]  ;;  %v54_v46 = vld [vmem:[%s2744_s0 + $0x150] sm:$0xff] }
  0x4a   :  { %v80_v47 = vld [vmem:[%s2744_s0 + $0x220] sm:$0xff]  ;;  %v58_v48 = vld [vmem:[%s2744_s0 + $0x170] sm:$0xff]  ;;  %v57_v49 = vld [vmem:[%s2744_s0 + $0x168] sm:$0xff] }
  0x4b   :  { %1505 = vmatmul.mubr.msk.f32.gmra.mrb[20].mxu0 %vm236_vm0, %v44_v11  ;;  %v83_v50 = vld [vmem:[%s2744_s0 + $0x238] sm:$0xff]  ;;  %v61_v51 = vld [vmem:[%s2744_s0 + $0x188] sm:$0xff]  ;;  %v60_v52 = vld [vmem:[%s2744_s0 + $0x180] sm:$0xff] }
  0x4c   :  { %458 = vmatmul.mubr.f32.gmra.mrb[4].mxu1 %v18_v10  ;;  %864 = vmatprep.mubr.f32.mxu0 %v1747_v7  ;;  %v86_v53 = vld [vmem:[%s2744_s0 + $0x250] sm:$0xff]  ;;  %v64_v54 = vld [vmem:[%s2744_s0 + $0x1a0] sm:$0xff]  ;;  %v63_v55 = vld [vmem:[%s2744_s0 + $0x198] sm:$0xff] }
  0x4d   :  { %463 = vmatprep.mubr.f32.mxu1 %v22_v12  ;;  %v89_v56 = vld [vmem:[%s2744_s0 + $0x268] sm:$0xff]  ;;  %v67_v57 = vld [vmem:[%s2744_s0 + $0x1b8] sm:$0xff]  ;;  %v66_v58 = vld [vmem:[%s2744_s0 + $0x1b0] sm:$0xff] }
  0x4e   :  { %v92_v59 = vld [vmem:[%s2744_s0 + $0x280] sm:$0xff]  ;;  %v70_v60 = vld [vmem:[%s2744_s0 + $0x1d0] sm:$0xff]  ;;  %v69_v61 = vld [vmem:[%s2744_s0 + $0x1c8] sm:$0xff] }
  0x4f   :  { %1506 = vmatmul.mubr.msk.f32.gmra.mrb[22].mxu0 %vm236_vm0, %v47_v14  ;;  %v95_v62 = vld [vmem:[%s2744_s0 + $0x298] sm:$0xff]  ;;  %v73_v63 = vld [vmem:[%s2744_s0 + $0x1e8] sm:$0xff]  ;;  %v72_v0 = vld [vmem:[%s2744_s0 + $0x1e0] sm:$0xff] }
  0x50   :  { %464 = vmatmul.mubr.f32.gmra.mrb[6].mxu1 %v21_v13  ;;  %870 = vmatprep.mubr.f32.mxu0 %v1747_v7  ;;  %v98_v1 = vld [vmem:[%s2744_s0 + $0x2b0] sm:$0xff]  ;;  %v76_v2 = vld [vmem:[%s2744_s0 + $0x200] sm:$0xff]  ;;  %v75_v3 = vld [vmem:[%s2744_s0 + $0x1f8] sm:$0xff] }
  0x51   :  { %469 = vmatprep.mubr.f32.mxu1 %v25_v15  ;;  %v101_v4 = vld [vmem:[%s2744_s0 + $0x2c8] sm:$0xff]  ;;  %v79_v5 = vld [vmem:[%s2744_s0 + $0x218] sm:$0xff]  ;;  %v78_v6 = vld [vmem:[%s2744_s0 + $0x210] sm:$0xff] }
  0x52   :  { %v104_v8 = vld [vmem:[%s2744_s0 + $0x2e0] sm:$0xff]  ;;  %v82_v9 = vld [vmem:[%s2744_s0 + $0x230] sm:$0xff]  ;;  %v81_v10 = vld [vmem:[%s2744_s0 + $0x228] sm:$0xff] }
  0x53   :  { %1507 = vmatmul.mubr.msk.f32.gmra.mrb[24].mxu0 %vm236_vm0, %v50_v17  ;;  %v107_v11 = vld [vmem:[%s2744_s0 + $0x2f8] sm:$0xff]  ;;  %v85_v12 = vld [vmem:[%s2744_s0 + $0x248] sm:$0xff]  ;;  %v84_v13 = vld [vmem:[%s2744_s0 + $0x240] sm:$0xff] }
  0x54   :  { %470 = vmatmul.mubr.f32.gmra.mrb[8].mxu1 %v24_v16  ;;  %876 = vmatprep.mubr.f32.mxu0 %v1747_v7  ;;  %v110_v14 = vld [vmem:[%s2744_s0 + $0x310] sm:$0xff]  ;;  %v88_v15 = vld [vmem:[%s2744_s0 + $0x260] sm:$0xff]  ;;  %v87_v16 = vld [vmem:[%s2744_s0 + $0x258] sm:$0xff] }
  0x55   :  { %475 = vmatprep.mubr.f32.mxu1 %v28_v18  ;;  %v113_v17 = vld [vmem:[%s2744_s0 + $0x328] sm:$0xff]  ;;  %v91_v18 = vld [vmem:[%s2744_s0 + $0x278] sm:$0xff] }
  0x57   :  { %1508 = vmatmul.mubr.msk.f32.gmra.mrb[26].mxu0 %vm236_vm0, %v53_v20  ;;  %v116_v20 = vld [vmem:[%s2744_s0 + $0x340] sm:$0xff] }
  0x58   :  { %476 = vmatmul.mubr.f32.gmra.mrb[10].mxu1 %v27_v19  ;;  %882 = vmatprep.mubr.f32.mxu0 %v1747_v7  ;;  %v90_v19 = vld [vmem:[%s2744_s0 + $0x270] sm:$0xff] }
  0x59   :  { %481 = vmatprep.mubr.f32.mxu1 %v31_v21  ;;  %v94_v21 = vld [vmem:[%s2744_s0 + $0x290] sm:$0xff] }
  0x5b   :  { %1509 = vmatmul.mubr.msk.f32.gmra.mrb[28].mxu0 %vm236_vm0, %v56_v23  ;;  %v119_v23 = vld [vmem:[%s2744_s0 + $0x358] sm:$0xff] }
  0x5c   :  { %482 = vmatmul.mubr.f32.gmra.mrb[12].mxu1 %v30_v22  ;;  %888 = vmatprep.mubr.f32.mxu0 %v1747_v7  ;;  %v93_v22 = vld [vmem:[%s2744_s0 + $0x288] sm:$0xff] }
  0x5d   :  { %487 = vmatprep.mubr.f32.mxu1 %v34_v24  ;;  %v97_v24 = vld [vmem:[%s2744_s0 + $0x2a8] sm:$0xff] }
  0x5f   :  { %1510 = vmatmul.mubr.msk.f32.gmra.mrb[30].mxu0 %vm236_vm0, %v59_v26  ;;  %v122_v26 = vld [vmem:[%s2744_s0 + $0x370] sm:$0xff] }
  0x60   :  { %488 = vmatmul.mubr.f32.gmra.mrb[14].mxu1 %v33_v25  ;;  %894 = vmatprep.mubr.f32.mxu0 %v1747_v7  ;;  %v96_v25 = vld [vmem:[%s2744_s0 + $0x2a0] sm:$0xff] }
  0x61   :  { %493 = vmatprep.mubr.f32.mxu1 %v37_v27  ;;  %v100_v27 = vld [vmem:[%s2744_s0 + $0x2c0] sm:$0xff] }
  0x63   :  { %1511 = vmatmul.mubr.msk.f32.gmra.mrb[32].mxu0 %vm236_vm0, %v62_v29  ;;  %v125_v29 = vld [vmem:[%s2744_s0 + $0x388] sm:$0xff] }
  0x64   :  { %494 = vmatmul.mubr.f32.gmra.mrb[16].mxu1 %v36_v28  ;;  %900 = vmatprep.mubr.f32.mxu0 %v1747_v7  ;;  %v99_v28 = vld [vmem:[%s2744_s0 + $0x2b8] sm:$0xff] }
  0x65   :  { %499 = vmatprep.mubr.f32.mxu1 %v40_v30  ;;  %v103_v30 = vld [vmem:[%s2744_s0 + $0x2d8] sm:$0xff] }
  0x67   :  { %1512 = vmatmul.mubr.msk.f32.gmra.mrb[34].mxu0 %vm236_vm0, %v65_v32  ;;  %v128_v32 = vld [vmem:[%s2744_s0 + $0x3a0] sm:$0xff] }
  0x68   :  { %500 = vmatmul.mubr.f32.gmra.mrb[18].mxu1 %v39_v31  ;;  %906 = vmatprep.mubr.f32.mxu0 %v1747_v7  ;;  %v102_v31 = vld [vmem:[%s2744_s0 + $0x2d0] sm:$0xff] }
  0x69   :  { %505 = vmatprep.mubr.f32.mxu1 %v43_v33  ;;  %v106_v33 = vld [vmem:[%s2744_s0 + $0x2f0] sm:$0xff] }
  0x6b   :  { %1513 = vmatmul.mubr.msk.f32.gmra.mrb[36].mxu0 %vm236_vm0, %v68_v35  ;;  %v131_v35 = vld [vmem:[%s2744_s0 + $0x3b8] sm:$0xff] }
  0x6c   :  { %506 = vmatmul.mubr.f32.gmra.mrb[20].mxu1 %v42_v34  ;;  %912 = vmatprep.mubr.f32.mxu0 %v1747_v7  ;;  %v105_v34 = vld [vmem:[%s2744_s0 + $0x2e8] sm:$0xff] }
  0x6d   :  { %511 = vmatprep.mubr.f32.mxu1 %v46_v36  ;;  %v109_v36 = vld [vmem:[%s2744_s0 + $0x308] sm:$0xff] }
  0x6f   :  { %1514 = vmatmul.mubr.msk.f32.gmra.mrb[38].mxu0 %vm236_vm0, %v71_v38  ;;  %v134_v38 = vld [vmem:[%s2744_s0 + $0x3d0] sm:$0xff] }
  0x70   :  { %512 = vmatmul.mubr.f32.gmra.mrb[22].mxu1 %v45_v37  ;;  %918 = vmatprep.mubr.f32.mxu0 %v1747_v7  ;;  %v108_v37 = vld [vmem:[%s2744_s0 + $0x300] sm:$0xff] }
  0x71   :  { %517 = vmatprep.mubr.f32.mxu1 %v49_v39  ;;  %v112_v39 = vld [vmem:[%s2744_s0 + $0x320] sm:$0xff] }
  0x73   :  { %1515 = vmatmul.mubr.msk.f32.gmra.mrb[40].mxu0 %vm236_vm0, %v74_v41  ;;  %v137_v41 = vld [vmem:[%s2744_s0 + $0x3e8] sm:$0xff] }
  0x74   :  { %518 = vmatmul.mubr.f32.gmra.mrb[24].mxu1 %v48_v40  ;;  %924 = vmatprep.mubr.f32.mxu0 %v1747_v7  ;;  %v111_v40 = vld [vmem:[%s2744_s0 + $0x318] sm:$0xff] }
  0x75   :  { %523 = vmatprep.mubr.f32.mxu1 %v52_v42  ;;  %v115_v42 = vld [vmem:[%s2744_s0 + $0x338] sm:$0xff] }
  0x77   :  { %1516 = vmatmul.mubr.msk.f32.gmra.mrb[42].mxu0 %vm236_vm0, %v77_v44  ;;  %v140_v44 = vld [vmem:[%s2744_s0 + $0x400] sm:$0xff] }
  0x78   :  { %524 = vmatmul.mubr.f32.gmra.mrb[26].mxu1 %v51_v43  ;;  %930 = vmatprep.mubr.f32.mxu0 %v1747_v7  ;;  %v114_v43 = vld [vmem:[%s2744_s0 + $0x330] sm:$0xff] }
  0x79   :  { %529 = vmatprep.mubr.f32.mxu1 %v55_v45  ;;  %v118_v45 = vld [vmem:[%s2744_s0 + $0x350] sm:$0xff] }
  0x7b   :  { %1517 = vmatmul.mubr.msk.f32.gmra.mrb[44].mxu0 %vm236_vm0, %v80_v47  ;;  %v143_v47 = vld [vmem:[%s2744_s0 + $0x418] sm:$0xff] }
  0x7c   :  { %530 = vmatmul.mubr.f32.gmra.mrb[28].mxu1 %v54_v46  ;;  %936 = vmatprep.mubr.f32.mxu0 %v1747_v7  ;;  %v117_v46 = vld [vmem:[%s2744_s0 + $0x348] sm:$0xff] }
  0x7d   :  { %535 = vmatprep.mubr.f32.mxu1 %v58_v48  ;;  %v121_v48 = vld [vmem:[%s2744_s0 + $0x368] sm:$0xff] }
  0x7f   :  { %1518 = vmatmul.mubr.msk.f32.gmra.mrb[46].mxu0 %vm236_vm0, %v83_v50  ;;  %v146_v50 = vld [vmem:[%s2744_s0 + $0x430] sm:$0xff] }
  0x80   :  { %536 = vmatmul.mubr.f32.gmra.mrb[30].mxu1 %v57_v49  ;;  %942 = vmatprep.mubr.f32.mxu0 %v1747_v7  ;;  %v120_v49 = vld [vmem:[%s2744_s0 + $0x360] sm:$0xff] }
  0x81   :  { %541 = vmatprep.mubr.f32.mxu1 %v61_v51  ;;  %v124_v51 = vld [vmem:[%s2744_s0 + $0x380] sm:$0xff] }
  0x83   :  { %1519 = vmatmul.mubr.msk.f32.gmra.mrb[48].mxu0 %vm236_vm0, %v86_v53  ;;  %v149_v53 = vld [vmem:[%s2744_s0 + $0x448] sm:$0xff] }
  0x84   :  { %542 = vmatmul.mubr.f32.gmra.mrb[32].mxu1 %v60_v52  ;;  %948 = vmatprep.mubr.f32.mxu0 %v1747_v7  ;;  %v123_v52 = vld [vmem:[%s2744_s0 + $0x378] sm:$0xff] }
  0x85   :  { %547 = vmatprep.mubr.f32.mxu1 %v64_v54  ;;  %v127_v54 = vld [vmem:[%s2744_s0 + $0x398] sm:$0xff] }
  0x87   :  { %1520 = vmatmul.mubr.msk.f32.gmra.mrb[50].mxu0 %vm236_vm0, %v89_v56  ;;  %v152_v56 = vld [vmem:[%s2744_s0 + $0x460] sm:$0xff] }
  0x88   :  { %548 = vmatmul.mubr.f32.gmra.mrb[34].mxu1 %v63_v55  ;;  %954 = vmatprep.mubr.f32.mxu0 %v1747_v7  ;;  %v126_v55 = vld [vmem:[%s2744_s0 + $0x390] sm:$0xff] }
  0x89   :  { %553 = vmatprep.mubr.f32.mxu1 %v67_v57  ;;  %v130_v57 = vld [vmem:[%s2744_s0 + $0x3b0] sm:$0xff] }
  0x8b   :  { %1521 = vmatmul.mubr.msk.f32.gmra.mrb[52].mxu0 %vm236_vm0, %v92_v59  ;;  %v155_v59 = vld [vmem:[%s2744_s0 + $0x478] sm:$0xff] }
  0x8c   :  { %554 = vmatmul.mubr.f32.gmra.mrb[36].mxu1 %v66_v58  ;;  %960 = vmatprep.mubr.f32.mxu0 %v1747_v7  ;;  %v129_v58 = vld [vmem:[%s2744_s0 + $0x3a8] sm:$0xff] }
  0x8d   :  { %559 = vmatprep.mubr.f32.mxu1 %v70_v60  ;;  %v133_v60 = vld [vmem:[%s2744_s0 + $0x3c8] sm:$0xff] }
  0x8f   :  { %1522 = vmatmul.mubr.msk.f32.gmra.mrb[54].mxu0 %vm236_vm0, %v95_v62  ;;  %v135_v62 = vld [vmem:[%s2744_s0 + $0x3d8] sm:$0xff] }
  0x90   :  { %560 = vmatmul.mubr.f32.gmra.mrb[38].mxu1 %v69_v61  ;;  %966 = vmatprep.mubr.f32.mxu0 %v1747_v7  ;;  %v132_v61 = vld [vmem:[%s2744_s0 + $0x3c0] sm:$0xff] }
  0x91   :  { %565 = vmatprep.mubr.f32.mxu1 %v73_v63  ;;  %v139_v63 = vld [vmem:[%s2744_s0 + $0x3f8] sm:$0xff] }
  0x93   :  { %1523 = vmatmul.mubr.msk.f32.gmra.mrb[56].mxu0 %vm236_vm0, %v98_v1  ;;  %v142_v1 = vld [vmem:[%s2744_s0 + $0x410] sm:$0xff] }
  0x94   :  { %566 = vmatmul.mubr.f32.gmra.mrb[40].mxu1 %v72_v0  ;;  %972 = vmatprep.mubr.f32.mxu0 %v1747_v7  ;;  %v138_v0 = vld [vmem:[%s2744_s0 + $0x3f0] sm:$0xff] }
  0x95   :  { %571 = vmatprep.mubr.f32.mxu1 %v76_v2  ;;  %v141_v2 = vld [vmem:[%s2744_s0 + $0x408] sm:$0xff] }
  0x97   :  { %1524 = vmatmul.mubr.msk.f32.gmra.mrb[58].mxu0 %vm236_vm0, %v101_v4  ;;  %v144_v4 = vld [vmem:[%s2744_s0 + $0x420] sm:$0xff] }
  0x98   :  { %572 = vmatmul.mubr.f32.gmra.mrb[42].mxu1 %v75_v3  ;;  %978 = vmatprep.mubr.f32.mxu0 %v1747_v7  ;;  %v145_v3 = vld [vmem:[%s2744_s0 + $0x428] sm:$0xff] }
  0x99   :  { %577 = vmatprep.mubr.f32.mxu1 %v79_v5  ;;  %v148_v5 = vld [vmem:[%s2744_s0 + $0x440] sm:$0xff] }
  0x9b   :  { %1525 = vmatmul.mubr.msk.f32.gmra.mrb[60].mxu0 %vm236_vm0, %v104_v8  ;;  %v151_v8 = vld [vmem:[%s2744_s0 + $0x458] sm:$0xff] }
  0x9c   :  { %578 = vmatmul.mubr.f32.gmra.mrb[44].mxu1 %v78_v6  ;;  %984 = vmatprep.mubr.f32.mxu0 %v1747_v7  ;;  %v147_v6 = vld [vmem:[%s2744_s0 + $0x438] sm:$0xff] }
  0x9d   :  { %583 = vmatprep.mubr.f32.mxu1 %v82_v9 }
  0x9f   :  { %1526 = vmatmul.mubr.msk.f32.gmra.mrb[62].mxu0 %vm236_vm0, %v107_v11  ;;  %v150_v11 = vld [vmem:[%s2744_s0 + $0x450] sm:$0xff] }
  0xa0   :  { %584 = vmatmul.mubr.f32.gmra.mrb[46].mxu1 %v81_v10  ;;  %990 = vmatprep.mubr.f32.mxu0 %v1747_v7 }
  0xa1   :  { %589 = vmatprep.mubr.f32.mxu1 %v85_v12  ;;  %v154_v12 = vld [vmem:[%s2744_s0 + $0x470] sm:$0xff] }
  0xa3   :  { %1527 = vmatmul.mubr.msk.f32.gmra.mrb[64].mxu0 %vm236_vm0, %v110_v14 }
  0xa4   :  { %590 = vmatmul.mubr.f32.gmra.mrb[48].mxu1 %v84_v13  ;;  %996 = vmatprep.mubr.f32.mxu0 %v1747_v7 }
  0xa5   :  { %595 = vmatprep.mubr.f32.mxu1 %v88_v15  ;;  %v153_v15 = vld [vmem:[%s2744_s0 + $0x468] sm:$0xff] }
  0xa7   :  { %1528 = vmatmul.mubr.msk.f32.gmra.mrb[66].mxu0 %vm236_vm0, %v113_v17 }
  0xa8   :  { %596 = vmatmul.mubr.f32.gmra.mrb[50].mxu1 %v87_v16  ;;  %1002 = vmatprep.mubr.f32.mxu0 %v1747_v7 }
  0xa9   :  { %601 = vmatprep.mubr.f32.mxu1 %v91_v18 }
  0xab   :  { %1529 = vmatmul.mubr.msk.f32.gmra.mrb[68].mxu0 %vm236_vm0, %v116_v20 }
  0xac   :  { %602 = vmatmul.mubr.f32.gmra.mrb[52].mxu1 %v90_v19  ;;  %1008 = vmatprep.mubr.f32.mxu0 %v1747_v7 }
  0xad   :  { %607 = vmatprep.mubr.f32.mxu1 %v94_v21 }
  0xaf   :  { %1530 = vmatmul.mubr.msk.f32.gmra.mrb[70].mxu0 %vm236_vm0, %v119_v23 }
  0xb0   :  { %608 = vmatmul.mubr.f32.gmra.mrb[54].mxu1 %v93_v22  ;;  %1014 = vmatprep.mubr.f32.mxu0 %v1747_v7 }
  0xb1   :  { %613 = vmatprep.mubr.f32.mxu1 %v97_v24 }
  0xb3   :  { %1531 = vmatmul.mubr.msk.f32.gmra.mrb[72].mxu0 %vm236_vm0, %v122_v26 }
  0xb4   :  { %614 = vmatmul.mubr.f32.gmra.mrb[56].mxu1 %v96_v25  ;;  %1020 = vmatprep.mubr.f32.mxu0 %v1747_v7 }
  0xb5   :  { %619 = vmatprep.mubr.f32.mxu1 %v100_v27 }
  0xb7   :  { %1532 = vmatmul.mubr.msk.f32.gmra.mrb[74].mxu0 %vm236_vm0, %v125_v29 }
  0xb8   :  { %620 = vmatmul.mubr.f32.gmra.mrb[58].mxu1 %v99_v28  ;;  %1026 = vmatprep.mubr.f32.mxu0 %v1747_v7 }
  0xb9   :  { %625 = vmatprep.mubr.f32.mxu1 %v103_v30 }
  0xbb   :  { %1533 = vmatmul.mubr.msk.f32.gmra.mrb[76].mxu0 %vm236_vm0, %v128_v32 }
  0xbc   :  { %626 = vmatmul.mubr.f32.gmra.mrb[60].mxu1 %v102_v31  ;;  %1032 = vmatprep.mubr.f32.mxu0 %v1747_v7 }
  0xbd   :  { %631 = vmatprep.mubr.f32.mxu1 %v106_v33 }
  0xbf   :  { %1534 = vmatmul.mubr.msk.f32.gmra.mrb[78].mxu0 %vm236_vm0, %v131_v35 }
  0xc0   :  { %632 = vmatmul.mubr.f32.gmra.mrb[62].mxu1 %v105_v34  ;;  %1038 = vmatprep.mubr.f32.mxu0 %v1747_v7 }
  0xc1   :  { %637 = vmatprep.mubr.f32.mxu1 %v109_v36 }
  0xc3   :  { %1535 = vmatmul.mubr.msk.f32.gmra.mrb[80].mxu0 %vm236_vm0, %v134_v38 }
  0xc4   :  { %638 = vmatmul.mubr.f32.gmra.mrb[64].mxu1 %v108_v37  ;;  %1044 = vmatprep.mubr.f32.mxu0 %v1747_v7 }
  0xc5   :  { %643 = vmatprep.mubr.f32.mxu1 %v112_v39 }
  0xc7   :  { %1536 = vmatmul.mubr.msk.f32.gmra.mrb[82].mxu0 %vm236_vm0, %v137_v41 }
  0xc8   :  { %644 = vmatmul.mubr.f32.gmra.mrb[66].mxu1 %v111_v40  ;;  %1050 = vmatprep.mubr.f32.mxu0 %v1747_v7 }
  0xc9   :  { %649 = vmatprep.mubr.f32.mxu1 %v115_v42 }
  0xcb   :  { %1537 = vmatmul.mubr.msk.f32.gmra.mrb[84].mxu0 %vm236_vm0, %v140_v44 }
  0xcc   :  { %650 = vmatmul.mubr.f32.gmra.mrb[68].mxu1 %v114_v43  ;;  %1056 = vmatprep.mubr.f32.mxu0 %v1747_v7 }
  0xcd   :  { %655 = vmatprep.mubr.f32.mxu1 %v118_v45 }
  0xcf   :  { %1538 = vmatmul.mubr.msk.f32.gmra.mrb[86].mxu0 %vm236_vm0, %v143_v47 }
  0xd0   :  { %656 = vmatmul.mubr.f32.gmra.mrb[70].mxu1 %v117_v46  ;;  %1062 = vmatprep.mubr.f32.mxu0 %v1747_v7 }
  0xd1   :  { %661 = vmatprep.mubr.f32.mxu1 %v121_v48 }
  0xd3   :  { %1539 = vmatmul.mubr.msk.f32.gmra.mrb[88].mxu0 %vm236_vm0, %v146_v50 }
  0xd4   :  { %662 = vmatmul.mubr.f32.gmra.mrb[72].mxu1 %v120_v49  ;;  %1068 = vmatprep.mubr.f32.mxu0 %v1747_v7 }
  0xd5   :  { %667 = vmatprep.mubr.f32.mxu1 %v124_v51 }
  0xd7   :  { %1540 = vmatmul.mubr.msk.f32.gmra.mrb[90].mxu0 %vm236_vm0, %v149_v53 }
  0xd8   :  { %668 = vmatmul.mubr.f32.gmra.mrb[74].mxu1 %v123_v52  ;;  %1074 = vmatprep.mubr.f32.mxu0 %v1747_v7 }
  0xd9   :  { %673 = vmatprep.mubr.f32.mxu1 %v127_v54 }
  0xdb   :  { %1541 = vmatmul.mubr.msk.f32.gmra.mrb[92].mxu0 %vm236_vm0, %v152_v56 }
  0xdc   :  { %674 = vmatmul.mubr.f32.gmra.mrb[76].mxu1 %v126_v55  ;;  %1080 = vmatprep.mubr.f32.mxu0 %v1747_v7  ;;  %v136_v7 = vld [vmem:[%s2744_s0 + $0x3e0] sm:$0xff]  ;;  %s1748_s0 = smov [#allocation2]  }
  0xdd   :  { %679 = vmatprep.mubr.f32.mxu1 %v130_v57  ;;  %s1484_s27 = sshll.u32 %s1748_s0, 4  ;;  %s1485_s27 = int_to_ptr.vmem [resolvable:$true] %s1484_s27 }
  0xde   :  { %s1723_s28 = scalar_lea.vmem %s1485_s27, 12288  ;;  %p1728_p1 = scmp.lt.s32.totalorder %s1485_s27, %s1485_s27 }
  0xdf   :  { %1542 = vmatmul.mubr.msk.f32.gmra.mrb[94].mxu0 %vm236_vm0, %v155_v59  ;;  %p1724_p0 = scmp.ne.s32.totalorder %s1485_s27, %s1723_s28  ;;  %p1729_p2 = scmp.lt.s32.totalorder %s1723_s28, %s1723_s28 }
  0xe0   :  { %680 = vmatmul.mubr.f32.gmra.mrb[78].mxu1 %v129_v58 }
  0xe1   :  { %685 = vmatprep.mubr.f32.mxu1 %v133_v60  ;;  %p1730_p3 = por %p1729_p2, %p1728_p1 }
  0xe3   :  { %p1731_p4 = pnand %p1730_p3, %p1724_p0 }
  0xe4   :  { %686 = vmatmul.mubr.f32.gmra.mrb[80].mxu1 %v132_v61 }
  0xe5   :  { %691 = vmatprep.mubr.f32.mxu1 %v136_v7 }
  0xe8   :  { %692 = vmatmul.mubr.f32.gmra.mrb[82].mxu1 %v135_v62 }
  0xe9   :  { %697 = vmatprep.mubr.f32.mxu1 %v139_v63 }
  0xec   :  { %698 = vmatmul.mubr.f32.gmra.mrb[84].mxu1 %v138_v0 }
  0xed   :  { %703 = vmatprep.mubr.f32.mxu1 %v142_v1 }
  0xef   :  { %v800_v9 = vpop.f32.mrb[0].mxu0 }
  0xf0   :  { %704 = vmatmul.mubr.f32.gmra.mrb[86].mxu1 %v141_v2  ;;  %v802_v10 = vpop.f32.mrb[1].mxu0 }
  0xf1   :  { %709 = vmatprep.mubr.f32.mxu1 %v145_v3 }
  0xf3   :  { %v806_v13 = vpop.f32.mrb[2].mxu0 }
  0xf4   :  { %710 = vmatmul.mubr.f32.gmra.mrb[88].mxu1 %v144_v4  ;;  %v808_v14 = vpop.f32.mrb[3].mxu0 }
  0xf5   :  { %715 = vmatprep.mubr.f32.mxu1 %v148_v5 }
  0xf7   :  { %v812_v16 = vpop.f32.mrb[4].mxu0 }
  0xf8   :  { %716 = vmatmul.mubr.f32.gmra.mrb[90].mxu1 %v147_v6  ;;  %v814_v17 = vpop.f32.mrb[5].mxu0 }
  0xf9   :  { %721 = vmatprep.mubr.f32.mxu1 %v151_v8 }
  0xfb   :  { %v818_v18 = vpop.f32.mrb[6].mxu0 }
  0xfc   :  { %722 = vmatmul.mubr.f32.gmra.mrb[92].mxu1 %v150_v11  ;;  %v820_v19 = vpop.f32.mrb[7].mxu0 }
  0xfd   :  { %727 = vmatprep.mubr.f32.mxu1 %v154_v12 }
  0xff   :  { %v824_v20 = vpop.f32.mrb[8].mxu0 }
 0x100   :  { %728 = vmatmul.mubr.f32.gmra.mrb[94].mxu1 %v153_v15  ;;  %v826_v21 = vpop.f32.mrb[9].mxu0 }
 0x103   :  { %v830_v22 = vpop.f32.mrb[10].mxu0 }
 0x104   :  { %v832_v23 = vpop.f32.mrb[11].mxu0 }
 0x10e   :  { %v836_v24 = vpop.f32.mrb[12].mxu0 }
 0x10f   :  { %v838_v25 = vpop.f32.mrb[13].mxu0 }
 0x112   :  { %v842_v26 = vpop.f32.mrb[14].mxu0 }
 0x113   :  { %v844_v27 = vpop.f32.mrb[15].mxu0 }
 0x116   :  { %v2534_v29 = vpop.f32.mrb[16].mxu0 }
 0x117   :  { %v447_v28 = vpop.f32.mrb[0].mxu1  ;;  %v2536_v32 = vpop.f32.mrb[17].mxu0 }
 0x118   :  { %v801_v30 = vadd.f32 %v800_v9, %v447_v28  ;;  %v449_v31 = vpop.f32.mrb[1].mxu1 }
 0x119   :  { %v803_v33 = vadd.f32 %v802_v10, %v449_v31 }
 0x11a   :  { %1091 = vst [vmem:[#allocation2] sm:$0xff] %v801_v30  ;;  %v2538_v35 = vpop.f32.mrb[18].mxu0 }
 0x11b   :  { %1092 = vst [vmem:[#allocation2 + $0x8] sm:$0xff] %v803_v33  ;;  %v453_v34 = vpop.f32.mrb[2].mxu1  ;;  %v2540_v38 = vpop.f32.mrb[19].mxu0 }
 0x11c   :  { %v807_v36 = vadd.f32 %v806_v13, %v453_v34  ;;  %v455_v37 = vpop.f32.mrb[3].mxu1 }
 0x11d   :  { %v809_v39 = vadd.f32 %v808_v14, %v455_v37 }
 0x11e   :  { %1093 = vst [vmem:[#allocation2 + $0x10] sm:$0xff] %v807_v36  ;;  %v2542_v41 = vpop.f32.mrb[20].mxu0 }
 0x11f   :  { %1094 = vst [vmem:[#allocation2 + $0x18] sm:$0xff] %v809_v39  ;;  %v459_v40 = vpop.f32.mrb[4].mxu1  ;;  %v2544_v44 = vpop.f32.mrb[21].mxu0 }
 0x120   :  { %v813_v42 = vadd.f32 %v812_v16, %v459_v40  ;;  %v461_v43 = vpop.f32.mrb[5].mxu1 }
 0x121   :  { %v815_v45 = vadd.f32 %v814_v17, %v461_v43 }
 0x122   :  { %1095 = vst [vmem:[#allocation2 + $0x20] sm:$0xff] %v813_v42  ;;  %v2546_v47 = vpop.f32.mrb[22].mxu0 }
 0x123   :  { %1096 = vst [vmem:[#allocation2 + $0x28] sm:$0xff] %v815_v45  ;;  %v465_v46 = vpop.f32.mrb[6].mxu1  ;;  %v2548_v50 = vpop.f32.mrb[23].mxu0 }
 0x124   :  { %v819_v48 = vadd.f32 %v818_v18, %v465_v46  ;;  %v467_v49 = vpop.f32.mrb[7].mxu1 }
 0x125   :  { %v821_v51 = vadd.f32 %v820_v19, %v467_v49 }
 0x126   :  { %1097 = vst [vmem:[#allocation2 + $0x30] sm:$0xff] %v819_v48  ;;  %v2550_v53 = vpop.f32.mrb[24].mxu0 }
 0x127   :  { %1098 = vst [vmem:[#allocation2 + $0x38] sm:$0xff] %v821_v51  ;;  %v471_v52 = vpop.f32.mrb[8].mxu1  ;;  %v2552_v56 = vpop.f32.mrb[25].mxu0 }
 0x128   :  { %v825_v54 = vadd.f32 %v824_v20, %v471_v52  ;;  %v473_v55 = vpop.f32.mrb[9].mxu1 }
 0x129   :  { %v827_v57 = vadd.f32 %v826_v21, %v473_v55 }
 0x12a   :  { %1099 = vst [vmem:[#allocation2 + $0x40] sm:$0xff] %v825_v54  ;;  %v2554_v59 = vpop.f32.mrb[26].mxu0 }
 0x12b   :  { %1100 = vst [vmem:[#allocation2 + $0x48] sm:$0xff] %v827_v57  ;;  %v477_v58 = vpop.f32.mrb[10].mxu1  ;;  %v2556_v7 = vpop.f32.mrb[27].mxu0 }
 0x12c   :  { %v831_v60 = vadd.f32 %v830_v22, %v477_v58  ;;  %v479_v61 = vpop.f32.mrb[11].mxu1 }
 0x12d   :  { %v833_v62 = vadd.f32 %v832_v23, %v479_v61 }
 0x12e   :  { %1101 = vst [vmem:[#allocation2 + $0x50] sm:$0xff] %v831_v60  ;;  %v2558_v0 = vpop.f32.mrb[28].mxu0 }
 0x12f   :  { %1102 = vst [vmem:[#allocation2 + $0x58] sm:$0xff] %v833_v62  ;;  %v483_v63 = vpop.f32.mrb[12].mxu1  ;;  %v2560_v3 = vpop.f32.mrb[29].mxu0 }
 0x130   :  { %v837_v1 = vadd.f32 %v836_v24, %v483_v63  ;;  %v485_v2 = vpop.f32.mrb[13].mxu1 }
 0x131   :  { %v839_v4 = vadd.f32 %v838_v25, %v485_v2 }
 0x132   :  { %1103 = vst [vmem:[#allocation2 + $0x60] sm:$0xff] %v837_v1  ;;  %v2562_v6 = vpop.f32.mrb[30].mxu0 }
 0x133   :  { %1104 = vst [vmem:[#allocation2 + $0x68] sm:$0xff] %v839_v4  ;;  %v489_v5 = vpop.f32.mrb[14].mxu1  ;;  %v2564_v10 = vpop.f32.mrb[31].mxu0 }
 0x134   :  { %v843_v8 = vadd.f32 %v842_v26, %v489_v5  ;;  %v491_v9 = vpop.f32.mrb[15].mxu1 }
 0x135   :  { %v845_v11 = vadd.f32 %v844_v27, %v491_v9 }
 0x136   :  { %1105 = vst [vmem:[#allocation2 + $0x70] sm:$0xff] %v843_v8  ;;  %v2566_v13 = vpop.f32.mrb[32].mxu0 }
 0x137   :  { %1106 = vst [vmem:[#allocation2 + $0x78] sm:$0xff] %v845_v11  ;;  %v495_v12 = vpop.f32.mrb[16].mxu1  ;;  %v2569_v16 = vpop.f32.mrb[33].mxu0 }
 0x138   :  { %v849_v14 = vadd.f32 %v2534_v29, %v495_v12  ;;  %v497_v15 = vpop.f32.mrb[17].mxu1 }
 0x139   :  { %v851_v17 = vadd.f32 %v2536_v32, %v497_v15 }
 0x13a   :  { %1107 = vst [vmem:[#allocation2 + $0x80] sm:$0xff] %v849_v14  ;;  %v2572_v19 = vpop.f32.mrb[34].mxu0 }
 0x13b   :  { %1108 = vst [vmem:[#allocation2 + $0x88] sm:$0xff] %v851_v17  ;;  %v501_v18 = vpop.f32.mrb[18].mxu1  ;;  %v2575_v22 = vpop.f32.mrb[35].mxu0 }
 0x13c   :  { %v855_v20 = vadd.f32 %v2538_v35, %v501_v18  ;;  %v503_v21 = vpop.f32.mrb[19].mxu1 }
 0x13d   :  { %v857_v23 = vadd.f32 %v2540_v38, %v503_v21 }
 0x13e   :  { %1109 = vst [vmem:[#allocation2 + $0x90] sm:$0xff] %v855_v20  ;;  %v2578_v25 = vpop.f32.mrb[36].mxu0 }
 0x13f   :  { %1110 = vst [vmem:[#allocation2 + $0x98] sm:$0xff] %v857_v23  ;;  %v507_v24 = vpop.f32.mrb[20].mxu1  ;;  %v2581_v28 = vpop.f32.mrb[37].mxu0 }
 0x140   :  { %v861_v26 = vadd.f32 %v2542_v41, %v507_v24  ;;  %v509_v27 = vpop.f32.mrb[21].mxu1 }
 0x141   :  { %v863_v29 = vadd.f32 %v2544_v44, %v509_v27 }
 0x142   :  { %1111 = vst [vmem:[#allocation2 + $0xa0] sm:$0xff] %v861_v26  ;;  %v2584_v31 = vpop.f32.mrb[38].mxu0 }
 0x143   :  { %1112 = vst [vmem:[#allocation2 + $0xa8] sm:$0xff] %v863_v29  ;;  %v513_v30 = vpop.f32.mrb[22].mxu1  ;;  %v2587_v34 = vpop.f32.mrb[39].mxu0 }
 0x144   :  { %v867_v32 = vadd.f32 %v2546_v47, %v513_v30  ;;  %v515_v33 = vpop.f32.mrb[23].mxu1 }
 0x145   :  { %v869_v35 = vadd.f32 %v2548_v50, %v515_v33 }
 0x146   :  { %1113 = vst [vmem:[#allocation2 + $0xb0] sm:$0xff] %v867_v32  ;;  %v2590_v37 = vpop.f32.mrb[40].mxu0 }
 0x147   :  { %1114 = vst [vmem:[#allocation2 + $0xb8] sm:$0xff] %v869_v35  ;;  %v519_v36 = vpop.f32.mrb[24].mxu1  ;;  %v2593_v40 = vpop.f32.mrb[41].mxu0 }
 0x148   :  { %v873_v38 = vadd.f32 %v2550_v53, %v519_v36  ;;  %v521_v39 = vpop.f32.mrb[25].mxu1 }
 0x149   :  { %v875_v41 = vadd.f32 %v2552_v56, %v521_v39 }
 0x14a   :  { %1115 = vst [vmem:[#allocation2 + $0xc0] sm:$0xff] %v873_v38  ;;  %v2596_v43 = vpop.f32.mrb[42].mxu0 }
 0x14b   :  { %1116 = vst [vmem:[#allocation2 + $0xc8] sm:$0xff] %v875_v41  ;;  %v525_v42 = vpop.f32.mrb[26].mxu1  ;;  %v2599_v46 = vpop.f32.mrb[43].mxu0 }
 0x14c   :  { %v879_v44 = vadd.f32 %v2554_v59, %v525_v42  ;;  %v527_v45 = vpop.f32.mrb[27].mxu1 }
 0x14d   :  { %v881_v47 = vadd.f32 %v2556_v7, %v527_v45 }
 0x14e   :  { %1117 = vst [vmem:[#allocation2 + $0xd0] sm:$0xff] %v879_v44  ;;  %v2602_v49 = vpop.f32.mrb[44].mxu0 }
 0x14f   :  { %1118 = vst [vmem:[#allocation2 + $0xd8] sm:$0xff] %v881_v47  ;;  %v531_v48 = vpop.f32.mrb[28].mxu1  ;;  %v2605_v52 = vpop.f32.mrb[45].mxu0 }
 0x150   :  { %v885_v50 = vadd.f32 %v2558_v0, %v531_v48  ;;  %v533_v51 = vpop.f32.mrb[29].mxu1 }
 0x151   :  { %v887_v53 = vadd.f32 %v2560_v3, %v533_v51 }
 0x152   :  { %1119 = vst [vmem:[#allocation2 + $0xe0] sm:$0xff] %v885_v50  ;;  %v2608_v55 = vpop.f32.mrb[46].mxu0 }
 0x153   :  { %1120 = vst [vmem:[#allocation2 + $0xe8] sm:$0xff] %v887_v53  ;;  %v537_v54 = vpop.f32.mrb[30].mxu1  ;;  %v2611_v58 = vpop.f32.mrb[47].mxu0 }
 0x154   :  { %v891_v56 = vadd.f32 %v2562_v6, %v537_v54  ;;  %v539_v57 = vpop.f32.mrb[31].mxu1 }
 0x155   :  { %v893_v59 = vadd.f32 %v2564_v10, %v539_v57 }
 0x156   :  { %1121 = vst [vmem:[#allocation2 + $0xf0] sm:$0xff] %v891_v56  ;;  %v2614_v61 = vpop.f32.mrb[48].mxu0 }
 0x157   :  { %1122 = vst [vmem:[#allocation2 + $0xf8] sm:$0xff] %v893_v59  ;;  %v543_v60 = vpop.f32.mrb[32].mxu1  ;;  %v2617_v63 = vpop.f32.mrb[49].mxu0 }
 0x158   :  { %v897_v7 = vadd.f32 %v2566_v13, %v543_v60  ;;  %v545_v62 = vpop.f32.mrb[33].mxu1 }
 0x159   :  { %v899_v0 = vadd.f32 %v2569_v16, %v545_v62 }
 0x15a   :  { %1123 = vst [vmem:[#allocation2 + $0x100] sm:$0xff] %v897_v7  ;;  %v2620_v2 = vpop.f32.mrb[50].mxu0 }
 0x15b   :  { %1124 = vst [vmem:[#allocation2 + $0x108] sm:$0xff] %v899_v0  ;;  %v549_v1 = vpop.f32.mrb[34].mxu1  ;;  %v2623_v5 = vpop.f32.mrb[51].mxu0 }
 0x15c   :  { %v903_v3 = vadd.f32 %v2572_v19, %v549_v1  ;;  %v551_v4 = vpop.f32.mrb[35].mxu1 }
 0x15d   :  { %v905_v6 = vadd.f32 %v2575_v22, %v551_v4 }
 0x15e   :  { %1125 = vst [vmem:[#allocation2 + $0x110] sm:$0xff] %v903_v3  ;;  %v2626_v9 = vpop.f32.mrb[52].mxu0 }
 0x15f   :  { %1126 = vst [vmem:[#allocation2 + $0x118] sm:$0xff] %v905_v6  ;;  %v555_v8 = vpop.f32.mrb[36].mxu1  ;;  %v2629_v12 = vpop.f32.mrb[53].mxu0 }
 0x160   :  { %v909_v10 = vadd.f32 %v2578_v25, %v555_v8  ;;  %v557_v11 = vpop.f32.mrb[37].mxu1 }
 0x161   :  { %v911_v13 = vadd.f32 %v2581_v28, %v557_v11 }
 0x162   :  { %1127 = vst [vmem:[#allocation2 + $0x120] sm:$0xff] %v909_v10  ;;  %v2632_v15 = vpop.f32.mrb[54].mxu0 }
 0x163   :  { %1128 = vst [vmem:[#allocation2 + $0x128] sm:$0xff] %v911_v13  ;;  %v561_v14 = vpop.f32.mrb[38].mxu1  ;;  %v2635_v18 = vpop.f32.mrb[55].mxu0 }
 0x164   :  { %v915_v16 = vadd.f32 %v2584_v31, %v561_v14  ;;  %v563_v17 = vpop.f32.mrb[39].mxu1 }
 0x165   :  { %v917_v19 = vadd.f32 %v2587_v34, %v563_v17 }
 0x166   :  { %1129 = vst [vmem:[#allocation2 + $0x130] sm:$0xff] %v915_v16  ;;  %v2638_v21 = vpop.f32.mrb[56].mxu0 }
 0x167   :  { %1130 = vst [vmem:[#allocation2 + $0x138] sm:$0xff] %v917_v19  ;;  %v567_v20 = vpop.f32.mrb[40].mxu1  ;;  %v2641_v24 = vpop.f32.mrb[57].mxu0 }
 0x168   :  { %v921_v22 = vadd.f32 %v2590_v37, %v567_v20  ;;  %v569_v23 = vpop.f32.mrb[41].mxu1 }
 0x169   :  { %v923_v25 = vadd.f32 %v2593_v40, %v569_v23 }
 0x16a   :  { %1131 = vst [vmem:[#allocation2 + $0x140] sm:$0xff] %v921_v22  ;;  %v2644_v27 = vpop.f32.mrb[58].mxu0 }
 0x16b   :  { %1132 = vst [vmem:[#allocation2 + $0x148] sm:$0xff] %v923_v25  ;;  %v573_v26 = vpop.f32.mrb[42].mxu1  ;;  %v2647_v30 = vpop.f32.mrb[59].mxu0 }
 0x16c   :  { %v927_v28 = vadd.f32 %v2596_v43, %v573_v26  ;;  %v575_v29 = vpop.f32.mrb[43].mxu1 }
 0x16d   :  { %v929_v31 = vadd.f32 %v2599_v46, %v575_v29 }
 0x16e   :  { %1133 = vst [vmem:[#allocation2 + $0x150] sm:$0xff] %v927_v28  ;;  %v2650_v33 = vpop.f32.mrb[60].mxu0 }
 0x16f   :  { %1134 = vst [vmem:[#allocation2 + $0x158] sm:$0xff] %v929_v31  ;;  %v579_v32 = vpop.f32.mrb[44].mxu1  ;;  %v2653_v36 = vpop.f32.mrb[61].mxu0 }
 0x170   :  { %v933_v34 = vadd.f32 %v2602_v49, %v579_v32  ;;  %v581_v35 = vpop.f32.mrb[45].mxu1 }
 0x171   :  { %v935_v37 = vadd.f32 %v2605_v52, %v581_v35 }
 0x172   :  { %1135 = vst [vmem:[#allocation2 + $0x160] sm:$0xff] %v933_v34  ;;  %v2656_v39 = vpop.f32.mrb[62].mxu0 }
 0x173   :  { %1136 = vst [vmem:[#allocation2 + $0x168] sm:$0xff] %v935_v37  ;;  %v585_v38 = vpop.f32.mrb[46].mxu1  ;;  %v2659_v42 = vpop.f32.mrb[63].mxu0 }
 0x174   :  { %v939_v40 = vadd.f32 %v2608_v55, %v585_v38  ;;  %v587_v41 = vpop.f32.mrb[47].mxu1 }
 0x175   :  { %v941_v43 = vadd.f32 %v2611_v58, %v587_v41 }
 0x176   :  { %1137 = vst [vmem:[#allocation2 + $0x170] sm:$0xff] %v939_v40  ;;  %v2662_v45 = vpop.f32.mrb[64].mxu0 }
 0x177   :  { %1138 = vst [vmem:[#allocation2 + $0x178] sm:$0xff] %v941_v43  ;;  %v591_v44 = vpop.f32.mrb[48].mxu1  ;;  %v2665_v48 = vpop.f32.mrb[65].mxu0 }
 0x178   :  { %v945_v46 = vadd.f32 %v2614_v61, %v591_v44  ;;  %v593_v47 = vpop.f32.mrb[49].mxu1 }
 0x179   :  { %v947_v49 = vadd.f32 %v2617_v63, %v593_v47 }
 0x17a   :  { %1139 = vst [vmem:[#allocation2 + $0x180] sm:$0xff] %v945_v46  ;;  %v2668_v51 = vpop.f32.mrb[66].mxu0 }
 0x17b   :  { %1140 = vst [vmem:[#allocation2 + $0x188] sm:$0xff] %v947_v49  ;;  %v597_v50 = vpop.f32.mrb[50].mxu1  ;;  %v2671_v54 = vpop.f32.mrb[67].mxu0 }
 0x17c   :  { %v951_v52 = vadd.f32 %v2620_v2, %v597_v50  ;;  %v599_v53 = vpop.f32.mrb[51].mxu1 }
 0x17d   :  { %v953_v55 = vadd.f32 %v2623_v5, %v599_v53 }
 0x17e   :  { %1141 = vst [vmem:[#allocation2 + $0x190] sm:$0xff] %v951_v52  ;;  %v2674_v57 = vpop.f32.mrb[68].mxu0 }
 0x17f   :  { %1142 = vst [vmem:[#allocation2 + $0x198] sm:$0xff] %v953_v55  ;;  %v603_v56 = vpop.f32.mrb[52].mxu1  ;;  %v2677_v60 = vpop.f32.mrb[69].mxu0 }
 0x180   :  { %v957_v58 = vadd.f32 %v2626_v9, %v603_v56  ;;  %v605_v59 = vpop.f32.mrb[53].mxu1 }
 0x181   :  { %v959_v61 = vadd.f32 %v2629_v12, %v605_v59 }
 0x182   :  { %1143 = vst [vmem:[#allocation2 + $0x1a0] sm:$0xff] %v957_v58  ;;  %v2680_v62 = vpop.f32.mrb[70].mxu0 }
 0x183   :  { %1144 = vst [vmem:[#allocation2 + $0x1a8] sm:$0xff] %v959_v61  ;;  %v609_v7 = vpop.f32.mrb[54].mxu1  ;;  %v2683_v1 = vpop.f32.mrb[71].mxu0 }
 0x184   :  { %v963_v63 = vadd.f32 %v2632_v15, %v609_v7  ;;  %v611_v0 = vpop.f32.mrb[55].mxu1 }
 0x185   :  { %v965_v2 = vadd.f32 %v2635_v18, %v611_v0 }
 0x186   :  { %1145 = vst [vmem:[#allocation2 + $0x1b0] sm:$0xff] %v963_v63  ;;  %v2686_v4 = vpop.f32.mrb[72].mxu0 }
 0x187   :  { %1146 = vst [vmem:[#allocation2 + $0x1b8] sm:$0xff] %v965_v2  ;;  %v615_v3 = vpop.f32.mrb[56].mxu1  ;;  %v2689_v8 = vpop.f32.mrb[73].mxu0 }
 0x188   :  { %v969_v5 = vadd.f32 %v2638_v21, %v615_v3  ;;  %v617_v6 = vpop.f32.mrb[57].mxu1 }
 0x189   :  { %v971_v9 = vadd.f32 %v2641_v24, %v617_v6 }
 0x18a   :  { %1147 = vst [vmem:[#allocation2 + $0x1c0] sm:$0xff] %v969_v5  ;;  %v2692_v11 = vpop.f32.mrb[74].mxu0 }
 0x18b   :  { %1148 = vst [vmem:[#allocation2 + $0x1c8] sm:$0xff] %v971_v9  ;;  %v621_v10 = vpop.f32.mrb[58].mxu1  ;;  %v2695_v14 = vpop.f32.mrb[75].mxu0 }
 0x18c   :  { %v975_v12 = vadd.f32 %v2644_v27, %v621_v10  ;;  %v623_v13 = vpop.f32.mrb[59].mxu1 }
 0x18d   :  { %v977_v15 = vadd.f32 %v2647_v30, %v623_v13 }
 0x18e   :  { %1149 = vst [vmem:[#allocation2 + $0x1d0] sm:$0xff] %v975_v12  ;;  %v2698_v17 = vpop.f32.mrb[76].mxu0 }
 0x18f   :  { %1150 = vst [vmem:[#allocation2 + $0x1d8] sm:$0xff] %v977_v15  ;;  %v627_v16 = vpop.f32.mrb[60].mxu1  ;;  %v2701_v20 = vpop.f32.mrb[77].mxu0 }
 0x190   :  { %v981_v18 = vadd.f32 %v2650_v33, %v627_v16  ;;  %v629_v19 = vpop.f32.mrb[61].mxu1 }
 0x191   :  { %v983_v21 = vadd.f32 %v2653_v36, %v629_v19 }
 0x192   :  { %1151 = vst [vmem:[#allocation2 + $0x1e0] sm:$0xff] %v981_v18  ;;  %v2704_v23 = vpop.f32.mrb[78].mxu0 }
 0x193   :  { %1152 = vst [vmem:[#allocation2 + $0x1e8] sm:$0xff] %v983_v21  ;;  %v633_v22 = vpop.f32.mrb[62].mxu1  ;;  %v2707_v26 = vpop.f32.mrb[79].mxu0 }
 0x194   :  { %v987_v24 = vadd.f32 %v2656_v39, %v633_v22  ;;  %v635_v25 = vpop.f32.mrb[63].mxu1 }
 0x195   :  { %v989_v27 = vadd.f32 %v2659_v42, %v635_v25 }
 0x196   :  { %1153 = vst [vmem:[#allocation2 + $0x1f0] sm:$0xff] %v987_v24  ;;  %v2710_v29 = vpop.f32.mrb[80].mxu0 }
 0x197   :  { %1154 = vst [vmem:[#allocation2 + $0x1f8] sm:$0xff] %v989_v27  ;;  %v639_v28 = vpop.f32.mrb[64].mxu1  ;;  %v2713_v32 = vpop.f32.mrb[81].mxu0 }
 0x198   :  { %v993_v30 = vadd.f32 %v2662_v45, %v639_v28  ;;  %v641_v31 = vpop.f32.mrb[65].mxu1 }
 0x199   :  { %v995_v33 = vadd.f32 %v2665_v48, %v641_v31 }
 0x19a   :  { %1155 = vst [vmem:[#allocation2 + $0x200] sm:$0xff] %v993_v30  ;;  %v1046_v35 = vpop.f32.mrb[82].mxu0 }
 0x19b   :  { %1156 = vst [vmem:[#allocation2 + $0x208] sm:$0xff] %v995_v33  ;;  %v645_v34 = vpop.f32.mrb[66].mxu1  ;;  %v1048_v38 = vpop.f32.mrb[83].mxu0 }
 0x19c   :  { %v999_v36 = vadd.f32 %v2668_v51, %v645_v34  ;;  %v647_v37 = vpop.f32.mrb[67].mxu1 }
 0x19d   :  { %v1001_v39 = vadd.f32 %v2671_v54, %v647_v37 }
 0x19e   :  { %1157 = vst [vmem:[#allocation2 + $0x210] sm:$0xff] %v999_v36  ;;  %v1052_v41 = vpop.f32.mrb[84].mxu0 }
 0x19f   :  { %1158 = vst [vmem:[#allocation2 + $0x218] sm:$0xff] %v1001_v39  ;;  %v651_v40 = vpop.f32.mrb[68].mxu1  ;;  %v1054_v44 = vpop.f32.mrb[85].mxu0 }
 0x1a0   :  { %v1005_v42 = vadd.f32 %v2674_v57, %v651_v40  ;;  %v653_v43 = vpop.f32.mrb[69].mxu1 }
 0x1a1   :  { %v1007_v45 = vadd.f32 %v2677_v60, %v653_v43 }
 0x1a2   :  { %1159 = vst [vmem:[#allocation2 + $0x220] sm:$0xff] %v1005_v42  ;;  %v1058_v47 = vpop.f32.mrb[86].mxu0 }
 0x1a3   :  { %1160 = vst [vmem:[#allocation2 + $0x228] sm:$0xff] %v1007_v45  ;;  %v657_v46 = vpop.f32.mrb[70].mxu1  ;;  %v1060_v50 = vpop.f32.mrb[87].mxu0 }
 0x1a4   :  { %v1011_v48 = vadd.f32 %v2680_v62, %v657_v46  ;;  %v659_v49 = vpop.f32.mrb[71].mxu1 }
 0x1a5   :  { %v1013_v51 = vadd.f32 %v2683_v1, %v659_v49 }
 0x1a6   :  { %1161 = vst [vmem:[#allocation2 + $0x230] sm:$0xff] %v1011_v48  ;;  %v1064_v53 = vpop.f32.mrb[88].mxu0 }
 0x1a7   :  { %1162 = vst [vmem:[#allocation2 + $0x238] sm:$0xff] %v1013_v51  ;;  %v663_v52 = vpop.f32.mrb[72].mxu1  ;;  %v1066_v56 = vpop.f32.mrb[89].mxu0 }
 0x1a8   :  { %v1017_v54 = vadd.f32 %v2686_v4, %v663_v52  ;;  %v665_v55 = vpop.f32.mrb[73].mxu1 }
 0x1a9   :  { %v1019_v57 = vadd.f32 %v2689_v8, %v665_v55 }
 0x1aa   :  { %1163 = vst [vmem:[#allocation2 + $0x240] sm:$0xff] %v1017_v54  ;;  %v1070_v59 = vpop.f32.mrb[90].mxu0 }
 0x1ab   :  { %1164 = vst [vmem:[#allocation2 + $0x248] sm:$0xff] %v1019_v57  ;;  %v669_v58 = vpop.f32.mrb[74].mxu1  ;;  %v1072_v7 = vpop.f32.mrb[91].mxu0 }
 0x1ac   :  { %v1023_v60 = vadd.f32 %v2692_v11, %v669_v58  ;;  %v671_v61 = vpop.f32.mrb[75].mxu1 }
 0x1ad   :  { %v1025_v62 = vadd.f32 %v2695_v14, %v671_v61 }
 0x1ae   :  { %1165 = vst [vmem:[#allocation2 + $0x250] sm:$0xff] %v1023_v60  ;;  %v1076_v0 = vpop.f32.mrb[92].mxu0 }
 0x1af   :  { %1166 = vst [vmem:[#allocation2 + $0x258] sm:$0xff] %v1025_v62  ;;  %v675_v63 = vpop.f32.mrb[76].mxu1  ;;  %v1078_v3 = vpop.f32.mrb[93].mxu0 }
 0x1b0   :  { %v1029_v1 = vadd.f32 %v2698_v17, %v675_v63  ;;  %v677_v2 = vpop.f32.mrb[77].mxu1 }
 0x1b1   :  { %v1031_v4 = vadd.f32 %v2701_v20, %v677_v2 }
 0x1b2   :  { %1167 = vst [vmem:[#allocation2 + $0x260] sm:$0xff] %v1029_v1  ;;  %v1082_v6 = vpop.f32.mrb[94].mxu0 }
 0x1b3   :  { %1168 = vst [vmem:[#allocation2 + $0x268] sm:$0xff] %v1031_v4  ;;  %v681_v5 = vpop.f32.mrb[78].mxu1  ;;  %v1084_v10 = vpop.f32.mrb[95].mxu0 }
 0x1b4   :  { %v1035_v8 = vadd.f32 %v2704_v23, %v681_v5  ;;  %v683_v9 = vpop.f32.mrb[79].mxu1 }
 0x1b5   :  { %v1037_v11 = vadd.f32 %v2707_v26, %v683_v9 }
 0x1b6   :  { %1169 = vst [vmem:[#allocation2 + $0x270] sm:$0xff] %v1035_v8 }
 0x1b7   :  { %1170 = vst [vmem:[#allocation2 + $0x278] sm:$0xff] %v1037_v11  ;;  %v687_v12 = vpop.f32.mrb[80].mxu1 }
 0x1b8   :  { %v1041_v13 = vadd.f32 %v2710_v29, %v687_v12  ;;  %v689_v14 = vpop.f32.mrb[81].mxu1 }
 0x1b9   :  { %v1043_v15 = vadd.f32 %v2713_v32, %v689_v14 }
 0x1ba   :  { %1171 = vst [vmem:[#allocation2 + $0x280] sm:$0xff] %v1041_v13 }
 0x1bb   :  { %1172 = vst [vmem:[#allocation2 + $0x288] sm:$0xff] %v1043_v15  ;;  %v693_v16 = vpop.f32.mrb[82].mxu1 }
 0x1bc   :  { %v1047_v17 = vadd.f32 %v1046_v35, %v693_v16  ;;  %v695_v18 = vpop.f32.mrb[83].mxu1 }
 0x1bd   :  { %v1049_v19 = vadd.f32 %v1048_v38, %v695_v18 }
 0x1be   :  { %1173 = vst [vmem:[#allocation2 + $0x290] sm:$0xff] %v1047_v17 }
 0x1bf   :  { %1174 = vst [vmem:[#allocation2 + $0x298] sm:$0xff] %v1049_v19  ;;  %v699_v20 = vpop.f32.mrb[84].mxu1 }
 0x1c0   :  { %v1053_v21 = vadd.f32 %v1052_v41, %v699_v20  ;;  %v701_v22 = vpop.f32.mrb[85].mxu1 }
 0x1c1   :  { %v1055_v23 = vadd.f32 %v1054_v44, %v701_v22 }
 0x1c2   :  { %1175 = vst [vmem:[#allocation2 + $0x2a0] sm:$0xff] %v1053_v21 }
 0x1c3   :  { %1176 = vst [vmem:[#allocation2 + $0x2a8] sm:$0xff] %v1055_v23  ;;  %v705_v24 = vpop.f32.mrb[86].mxu1 }
 0x1c4   :  { %v1059_v25 = vadd.f32 %v1058_v47, %v705_v24  ;;  %v707_v26 = vpop.f32.mrb[87].mxu1 }
 0x1c5   :  { %v1061_v27 = vadd.f32 %v1060_v50, %v707_v26 }
 0x1c6   :  { %1177 = vst [vmem:[#allocation2 + $0x2b0] sm:$0xff] %v1059_v25 }
 0x1c7   :  { %1178 = vst [vmem:[#allocation2 + $0x2b8] sm:$0xff] %v1061_v27  ;;  %v711_v28 = vpop.f32.mrb[88].mxu1 }
 0x1c8   :  { %v1065_v29 = vadd.f32 %v1064_v53, %v711_v28  ;;  %v713_v30 = vpop.f32.mrb[89].mxu1 }
 0x1c9   :  { %v1067_v31 = vadd.f32 %v1066_v56, %v713_v30 }
 0x1ca   :  { %1179 = vst [vmem:[#allocation2 + $0x2c0] sm:$0xff] %v1065_v29 }
 0x1cb   :  { %1180 = vst [vmem:[#allocation2 + $0x2c8] sm:$0xff] %v1067_v31  ;;  %v717_v32 = vpop.f32.mrb[90].mxu1 }
 0x1cc   :  { %v1071_v33 = vadd.f32 %v1070_v59, %v717_v32  ;;  %v719_v34 = vpop.f32.mrb[91].mxu1 }
 0x1cd   :  { %v1073_v35 = vadd.f32 %v1072_v7, %v719_v34 }
 0x1ce   :  { %1181 = vst [vmem:[#allocation2 + $0x2d0] sm:$0xff] %v1071_v33 }
 0x1cf   :  { %1182 = vst [vmem:[#allocation2 + $0x2d8] sm:$0xff] %v1073_v35  ;;  %v723_v36 = vpop.f32.mrb[92].mxu1 }
 0x1d0   :  { %v1077_v37 = vadd.f32 %v1076_v0, %v723_v36  ;;  %v725_v38 = vpop.f32.mrb[93].mxu1 }
 0x1d1   :  { %v1079_v39 = vadd.f32 %v1078_v3, %v725_v38 }
 0x1d2   :  { %1183 = vst [vmem:[#allocation2 + $0x2e0] sm:$0xff] %v1077_v37 }
 0x1d3   :  { %1184 = vst [vmem:[#allocation2 + $0x2e8] sm:$0xff] %v1079_v39  ;;  %v729_v40 = vpop.f32.mrb[94].mxu1 }
 0x1d4   :  { %v1083_v41 = vadd.f32 %v1082_v6, %v729_v40  ;;  %v731_v42 = vpop.f32.mrb[95].mxu1 }
 0x1d5   :  { %v1085_v43 = vadd.f32 %v1084_v10, %v731_v42 }
 0x1d6   :  { %1185 = vst [vmem:[#allocation2 + $0x2f0] sm:$0xff] %v1083_v41 }
 0x1d7   :  { %1186 = vst [vmem:[#allocation2 + $0x2f8] sm:$0xff] %v1085_v43 }
 0x1d8   :  { %1734 = shalt.err (!%p1731_p4)
}
 0x1d9   :  { %s1735_s3 = scalar_lea.hbm %s2746_s2, 12288 }
 0x1da   :  { %p1736_p5 = scmp.ne.s32.totalorder %s2746_s2, %s1735_s3  ;;  %p1739_p6 = scmp.lt.u32.totalorder %s1735_s3, %s2746_s2 }
 0x1dc   :  { %p1741_p7 = pnand %p1739_p6, %p1736_p5 }
 0x1de   :  { %1744 = shalt.err (!%p1741_p7)
}
 0x1df   :  { %s1749_s8 = smov 256   ;;  %s1750_s9 = smov 16  }
 0x1e0   :  { %1490 = dma.vmem_to_hbm [thread:$0]  %s1485_s27, 12288, %s2746_s2, [#allocation3], %s1749_s8, %s1749_s8, %s1750_s9  }
 0x1e1   :  { %1745 = dma.done.wait [#allocation3], 12288  }
 0x1e2   :  { %1746 = vsyncadd [#allocation3], 4294955008 }
 0x1e3   :  { %1494 = vsyncpa [#allocation3], 1 }

</bundles_post_ra>
